<compile_context>
chip_gen: v5e
topology: v5e:2x2
jax: 0.10.0
libtpu: 0.0.40
codegen_flags: <defaults>
</compile_context>

<pallas_src>
import functools
import math

import jax
import jax.numpy as jnp
from jax.experimental import pallas as pl
from jax.experimental.pallas import tpu as pltpu

# MXU operand dtype (accumulation is always f32 via preferred_element_type).
_MXU_DTYPE = jnp.bfloat16


# ------------------------------ Pallas kernel ------------------------------ #
def _make_fused_conv_kernel(khs, H, apply_relu):
    """Kernel computing relu?( sum_i conv_same(x_i, w_i) + bias ) for one image.

    Refs (in order): n input slabs (Hp_i, Wp_i*Cin_i), n banded weights
    (KH_i, Wp_i*Cin_i, W*Cout), bias row (1, W*Cout), output (H, W*Cout).
    """
    n = len(khs)

    def kernel(*refs):
        x_refs = refs[:n]
        w_refs = refs[n:2 * n]
        b_ref = refs[2 * n]
        o_ref = refs[2 * n + 1]

        acc = jnp.zeros(o_ref.shape, jnp.float32)
        for x_ref, w_ref, kh_extent in zip(x_refs, w_refs, khs):
            # In-kernel "im2col": KH shifted row-slabs, each one MXU matmul with
            # the banded weight (contraction over Wp*Cin).
            for kh in range(kh_extent):
                acc += jnp.dot(x_ref[kh:kh + H, :], w_ref[kh],
                               preferred_element_type=jnp.float32)
        acc = acc + b_ref[...].astype(jnp.float32)      # f32 epilogue
        if apply_relu:
            acc = jnp.maximum(acc, 0.0)
        o_ref[...] = acc.astype(o_ref.dtype)

    return kernel


# ------------------------------ host wrappers ------------------------------ #
def _banded_weight(w, W, dtype):
    """HWIO conv weight -> banded matmul weight (KH, (W+KW-1)*Cin, W*Cout)."""
    KH, KW, Cin, Cout = w.shape
    wflat = w.reshape(KH, KW * Cin, Cout)
    cols = [jnp.pad(wflat, ((0, 0), (wi * Cin, (W - 1 - wi) * Cin), (0, 0)))
            for wi in range(W)]
    band = jnp.stack(cols, axis=2)                      # (KH, Wp*Cin, W, Cout)
    return band.reshape(KH, (W + KW - 1) * Cin, W * Cout).astype(dtype)


def fused_conv_same(xs, ws, bias, *, apply_relu, out_dtype):
    """relu?( sum_i conv2d_same(xs[i], ws[i]) + bias ), one Pallas call.

    xs: list of NHWC inputs (same N,H,W).  ws: list of HWIO weights (same Cout,
    odd kernel sizes, stride 1, padding (k-1)//2).  bias: (Cout,).
    Returns (N, H, W, Cout) in `out_dtype`.
    """
    N, H, W, _ = xs[0].shape
    Cout = int(ws[0].shape[-1])
    khs = tuple(int(w.shape[0]) for w in ws)

    x_ops, w_ops, x_specs = [], [], []
    block_bytes = 0
    for x, w in zip(xs, ws):
        KH, KW, Cin, _ = w.shape
        assert KH % 2 == 1 and KW % 2 == 1, "odd kernel sizes required ('same')"
        ph, pw = (KH - 1) // 2, (KW - 1) // 2
        Hp, Wp = H + KH - 1, W + KW - 1
        xp = jnp.pad(x, ((0, 0), (ph, ph), (pw, pw), (0, 0)))
        xf = xp.reshape(N, Hp, Wp * Cin).astype(_MXU_DTYPE)   # halo-padded slab
        x_ops.append(xf)
        w_ops.append(_banded_weight(w, W, _MXU_DTYPE))
        x_specs.append(pl.BlockSpec((None, Hp, Wp * Cin), lambda n: (n, 0, 0)))
        block_bytes += Hp * Wp * Cin * 2 + KH * Wp * Cin * W * Cout * 2

    w_specs = [pl.BlockSpec(wop.shape, lambda n: (0, 0, 0)) for wop in w_ops]
    brow = jnp.tile(bias.astype(jnp.float32), W).reshape(1, W * Cout)
    b_spec = pl.BlockSpec((1, W * Cout), lambda n: (0, 0))
    out_spec = pl.BlockSpec((None, H, W * Cout), lambda n: (n, 0, 0))
    block_bytes += W * Cout * 4 + H * W * Cout * jnp.dtype(out_dtype).itemsize

    # Double-buffered blocks + headroom; tiny on every TPU generation.
    vmem_limit = int(max(4 * 1024 * 1024, 2 * block_bytes + (1 << 20)))

    kernel = _make_fused_conv_kernel(khs, H, apply_relu)
    out = pl.pallas_call(
        kernel,
        out_shape=jax.ShapeDtypeStruct((N, H, W * Cout), out_dtype),
        grid=(N,),
        in_specs=x_specs + w_specs + [b_spec],
        out_specs=out_spec,
        compiler_params=pltpu.CompilerParams(
            dimension_semantics=("parallel",),
            vmem_limit_bytes=vmem_limit),
    )(*x_ops, *w_ops, brow)
    return out.reshape(N, H, W, Cout)


# --------------------------- parameters / model ---------------------------- #
def init_conv_scale_params(key, input_channels, output_channels, kernel_size,
                           dtype=jnp.float32):
    """Deterministic PyTorch-Conv2d-style uniform init (synthetic weights)."""
    hidden = max(1, int(input_channels / 2))
    out_c = int(max(1, output_channels / 4))
    k0, k1, k2, k3 = kernel_size

    def conv_params(k, kh, kw, cin, cout):
        wk, bk = jax.random.split(k)
        bound = 1.0 / math.sqrt(cin * kh * kw)
        w = jax.random.uniform(wk, (kh, kw, cin, cout), dtype, -bound, bound)
        b = jax.random.uniform(bk, (cout,), dtype, -bound, bound)
        return w, b

    keys = jax.random.split(key, 8)
    return {
        "conv1":       conv_params(keys[0], k0, k0, input_channels, out_c),
        "conv2_1":     conv_params(keys[1], k0, k0, input_channels, hidden),
        "conv3_1":     conv_params(keys[2], k0, k0, input_channels, hidden),
        "conv4_1":     conv_params(keys[3], k0, k0, input_channels, hidden),
        "conv2":       conv_params(keys[4], k1, k1, hidden, out_c),
        "conv3":       conv_params(keys[5], k2, k2, hidden, out_c),
        "conv4":       conv_params(keys[6], k3, k3, hidden, out_c),
        "conv_result": conv_params(keys[7], 1, 1, 4, 1),
    }


def conv_scale_forward(x_nchw, params, input_channels, output_channels):
    """Pallas-backed ConvScale.forward. Input/output are NCHW (PyTorch style)."""
    out_c = int(max(1, output_channels / 4))
    x = jnp.transpose(x_nchw, (0, 2, 3, 1))             # NCHW -> NHWC

    w1, b1 = params["conv1"]
    w2, b2 = params["conv2"]
    w3, b3 = params["conv3"]
    w4, b4 = params["conv4"]

    if input_channels == 1:
        # conv1..conv4 all read x directly -> everything fuses into stage 2.
        branch_xs = [x, x, x, x]
    else:
        # Stage 1: the three k0 x k0 convs on x, fused along Cout (one call).
        w21, b21 = params["conv2_1"]
        w31, b31 = params["conv3_1"]
        w41, b41 = params["conv4_1"]
        hidden = w21.shape[-1]
        h = fused_conv_same(
            [x],
            [jnp.concatenate([w21, w31, w41], axis=-1)],
            jnp.concatenate([b21, b31, b41]),
            apply_relu=False, out_dtype=_MXU_DTYPE)
        h2 = h[..., :hidden]
        h3 = h[..., hidden:2 * hidden]
        h4 = h[..., 2 * hidden:]
        branch_xs = [x, h2, h3, h4]

    branch_ws = [w1, w2, w3, w4]
    branch_bs = [b1, b2, b3, b4]

    # Stage 2: conv1 + conv2 + conv3 + conv4 + concat (+ 1x1 conv_result) + ReLU
    # in a single call.  Concat / conv_result are linear -> folded into weights.
    if out_c == 1:
        wr, br = params["conv_result"]                  # (1,1,4,1), (1,)
        wr_vec = wr.reshape(4)
        eff_ws = [branch_ws[i] * wr_vec[i] for i in range(4)]
        eff_b = sum(wr_vec[i] * branch_bs[i] for i in range(4)) + br
    else:
        eff_ws = [jnp.pad(branch_ws[i],
                          ((0, 0), (0, 0), (0, 0),
                           (i * out_c, (3 - i) * out_c)))
                  for i in range(4)]
        eff_b = jnp.concatenate(branch_bs)

    out = fused_conv_same(branch_xs, eff_ws, eff_b,
                          apply_relu=True, out_dtype=x.dtype)
    return jnp.transpose(out, (0, 3, 1, 2))             # NHWC -> NCHW


# ------------------------------ pure-JAX ref -------------------------------- #
def _conv_ref(x, w, b):
    KH, KW = w.shape[0], w.shape[1]
    ph, pw = (KH - 1) // 2, (KW - 1) // 2
    out = jax.lax.conv_general_dilated(
        x, w, window_strides=(1, 1), padding=[(ph, ph), (pw, pw)],
        dimension_numbers=("NHWC", "HWIO", "NHWC"),
        precision=jax.lax.Precision.HIGHEST)
    return out + b


def conv_scale_ref(x_nchw, params, input_channels, output_channels):
    out_c = int(max(1, output_channels / 4))
    x = jnp.transpose(x_nchw, (0, 2, 3, 1))
    o1 = _conv_ref(x, *params["conv1"])
    if input_channels == 1:
        o2 = _conv_ref(x, *params["conv2"])
        o3 = _conv_ref(x, *params["conv3"])
        o4 = _conv_ref(x, *params["conv4"])
    else:
        o2 = _conv_ref(_conv_ref(x, *params["conv2_1"]), *params["conv2"])
        o3 = _conv_ref(_conv_ref(x, *params["conv3_1"]), *params["conv3"])
        o4 = _conv_ref(_conv_ref(x, *params["conv4_1"]), *params["conv4"])
    cat = jnp.concatenate([o1, o2, o3, o4], axis=-1)
    if out_c == 1:
        out = jax.nn.relu(_conv_ref(cat, *params["conv_result"]))
    else:
        out = jax.nn.relu(cat)
    return jnp.transpose(out, (0, 3, 1, 2))


# ---------------------------------- main ----------------------------------- #
if __name__ == "__main__":
    def run_case(input_channels, output_channels, kernel_size, N, H, W, seed, tol):
        key = jax.random.PRNGKey(seed)
        pkey, xkey = jax.random.split(key)
        params = init_conv_scale_params(pkey, input_channels, output_channels,
                                        kernel_size)
        x = jax.random.normal(xkey, (N, input_channels, H, W), jnp.float32)

        fwd = jax.jit(functools.partial(conv_scale_forward,
                                        input_channels=input_channels,
                                        output_channels=output_channels))
        out = jax.block_until_ready(fwd(x, params))
        ref = conv_scale_ref(x, params, input_channels, output_channels)

        out_c = int(max(1, output_channels / 4))
        expected_c = 1 if out_c == 1 else 4 * out_c
        assert out.shape == (N, expected_c, H, W), out.shape
        max_err = float(jnp.max(jnp.abs(out - ref)))
        # tolerance sized for bf16 MXU operands with f32 accumulation
        assert jnp.allclose(out, ref, atol=tol, rtol=tol), f"max_err={max_err}"

    # main config (out_c != 1 path: ReLU(cat) epilogue)
    run_case(input_channels=4, output_channels=8, kernel_size=(3, 3, 5, 7),
             N=2, H=16, W=16, seed=0, tol=2e-2)
    # out_c == 1 path (1x1 conv_result folded into the banded weights)
    run_case(input_channels=4, output_channels=4, kernel_size=(3, 3, 5, 7),
             N=2, H=16, W=16, seed=1, tol=2e-2)

    print("KERNEL_OK")
</pallas_src>

<mosaic_0001>
module attributes {stable_mosaic.version = 11 : i64} {
  func.func @kernel(%arg0: i32, %arg1: memref<1x18x72xbf16, #tpu.memory_space<vmem>>, %arg2: memref<3x72x96xbf16, #tpu.memory_space<vmem>>, %arg3: memref<1x96xf32, #tpu.memory_space<vmem>>, %arg4: memref<1x16x96xbf16, #tpu.memory_space<vmem>>) attributes {dimension_semantics = [#tpu.dimension_semantics<parallel>], iteration_bounds = array<i64: 2>, scalar_prefetch = 0 : i64, scratch_operands = 0 : i64, tpu.core_type = #tpu.core_type<tc>, window_params = [{transform_indices = @transform_0, window_bounds = array<i64: 1, 18, 72>}, {pipeline_mode = #tpu.pipeline_mode<synchronous>, transform_indices = @transform_1, window_bounds = array<i64: 3, 72, 96>}, {pipeline_mode = #tpu.pipeline_mode<synchronous>, transform_indices = @transform_2, window_bounds = array<i64: 1, 96>}, {transform_indices = @transform_3, window_bounds = array<i64: 1, 16, 96>}]} {
    %cst = arith.constant 0.000000e+00 : f32
    %0 = vector.broadcast %cst : f32 to vector<16x96xf32>
    %c0 = arith.constant 0 : index
    %c0_0 = arith.constant 0 : index
    %c0_1 = arith.constant 0 : index
    %1 = vector.load %arg1[%c0, %c0_0, %c0_1] : memref<1x18x72xbf16, #tpu.memory_space<vmem>>, vector<1x16x72xbf16>
    %2 = vector.shape_cast %1 : vector<1x16x72xbf16> to vector<16x72xbf16>
    %c0_2 = arith.constant 0 : index
    %c0_3 = arith.constant 0 : index
    %c0_4 = arith.constant 0 : index
    %3 = vector.load %arg2[%c0_2, %c0_3, %c0_4] : memref<3x72x96xbf16, #tpu.memory_space<vmem>>, vector<1x72x96xbf16>
    %4 = vector.shape_cast %3 : vector<1x72x96xbf16> to vector<72x96xbf16>
    %cst_5 = arith.constant dense<0.000000e+00> : vector<16x96xf32>
    %5 = tpu.matmul %2, %4, %cst_5 {dimension_numbers = #tpu.dot_dimension_numbers<[1], [0], [0], [1], [0, 0, 1, 1], [], []>} : vector<16x72xbf16>, vector<72x96xbf16>, vector<16x96xf32> -> vector<16x96xf32>
    %6 = arith.addf %0, %5 : vector<16x96xf32>
    %c0_6 = arith.constant 0 : index
    %c1 = arith.constant 1 : index
    %c0_7 = arith.constant 0 : index
    %7 = vector.load %arg1[%c0_6, %c1, %c0_7] : memref<1x18x72xbf16, #tpu.memory_space<vmem>>, vector<1x16x72xbf16>
    %8 = vector.shape_cast %7 : vector<1x16x72xbf16> to vector<16x72xbf16>
    %c1_8 = arith.constant 1 : index
    %c0_9 = arith.constant 0 : index
    %c0_10 = arith.constant 0 : index
    %9 = vector.load %arg2[%c1_8, %c0_9, %c0_10] : memref<3x72x96xbf16, #tpu.memory_space<vmem>>, vector<1x72x96xbf16>
    %10 = vector.shape_cast %9 : vector<1x72x96xbf16> to vector<72x96xbf16>
    %cst_11 = arith.constant dense<0.000000e+00> : vector<16x96xf32>
    %11 = tpu.matmul %8, %10, %cst_11 {dimension_numbers = #tpu.dot_dimension_numbers<[1], [0], [0], [1], [0, 0, 1, 1], [], []>} : vector<16x72xbf16>, vector<72x96xbf16>, vector<16x96xf32> -> vector<16x96xf32>
    %12 = arith.addf %6, %11 : vector<16x96xf32>
    %c0_12 = arith.constant 0 : index
    %c2 = arith.constant 2 : index
    %c0_13 = arith.constant 0 : index
    %13 = vector.load %arg1[%c0_12, %c2, %c0_13] : memref<1x18x72xbf16, #tpu.memory_space<vmem>>, vector<1x16x72xbf16>
    %14 = vector.shape_cast %13 : vector<1x16x72xbf16> to vector<16x72xbf16>
    %c2_14 = arith.constant 2 : index
    %c0_15 = arith.constant 0 : index
    %c0_16 = arith.constant 0 : index
    %15 = vector.load %arg2[%c2_14, %c0_15, %c0_16] : memref<3x72x96xbf16, #tpu.memory_space<vmem>>, vector<1x72x96xbf16>
    %16 = vector.shape_cast %15 : vector<1x72x96xbf16> to vector<72x96xbf16>
    %cst_17 = arith.constant dense<0.000000e+00> : vector<16x96xf32>
    %17 = tpu.matmul %14, %16, %cst_17 {dimension_numbers = #tpu.dot_dimension_numbers<[1], [0], [0], [1], [0, 0, 1, 1], [], []>} : vector<16x72xbf16>, vector<72x96xbf16>, vector<16x96xf32> -> vector<16x96xf32>
    %18 = arith.addf %12, %17 : vector<16x96xf32>
    %c0_18 = arith.constant 0 : index
    %c0_19 = arith.constant 0 : index
    %19 = vector.load %arg3[%c0_18, %c0_19] : memref<1x96xf32, #tpu.memory_space<vmem>>, vector<1x96xf32>
    %20 = vector.broadcast %19 : vector<1x96xf32> to vector<16x96xf32>
    %21 = arith.addf %18, %20 : vector<16x96xf32>
    %22 = arith.truncf %21 : vector<16x96xf32> to vector<16x96xbf16>
    %c0_20 = arith.constant 0 : index
    %c0_21 = arith.constant 0 : index
    %c0_22 = arith.constant 0 : index
    %23 = vector.load %arg4[%c0_20, %c0_21, %c0_22] : memref<1x16x96xbf16, #tpu.memory_space<vmem>>, vector<1x16x96xbf16>
    %24 = vector.shape_cast %23 : vector<1x16x96xbf16> to vector<16x96xbf16>
    %25 = vector.shape_cast %22 : vector<16x96xbf16> to vector<1x16x96xbf16>
    tpu.vector_store %arg4[%c0_20, %c0_21, %c0_22], %25 {strides = array<i32>} : memref<1x16x96xbf16, #tpu.memory_space<vmem>>, vector<1x16x96xbf16>,
    return
  }
  func.func @transform_0(%arg0: i32) -> (i32, i32, i32) {
    %c0_i32 = arith.constant 0 : i32
    %c0_i32_0 = arith.constant 0 : i32
    %c0_i32_1 = arith.constant 0 : i32
    return %arg0, %c0_i32, %c0_i32_0 : i32, i32, i32
  }
  func.func @transform_1(%arg0: i32) -> (i32, i32, i32) {
    %c0_i32 = arith.constant 0 : i32
    %c0_i32_0 = arith.constant 0 : i32
    %c0_i32_1 = arith.constant 0 : i32
    %c0_i32_2 = arith.constant 0 : i32
    return %c0_i32, %c0_i32_0, %c0_i32_1 : i32, i32, i32
  }
  func.func @transform_2(%arg0: i32) -> (i32, i32) {
    %c0_i32 = arith.constant 0 : i32
    %c0_i32_0 = arith.constant 0 : i32
    %c0_i32_1 = arith.constant 0 : i32
    return %c0_i32, %c0_i32_0 : i32, i32
  }
  func.func @transform_3(%arg0: i32) -> (i32, i32, i32) {
    %c0_i32 = arith.constant 0 : i32
    %c0_i32_0 = arith.constant 0 : i32
    %c0_i32_1 = arith.constant 0 : i32
    return %arg0, %c0_i32, %c0_i32_0 : i32, i32, i32
  }
}

module attributes {stable_mosaic.version = 11 : i64} {
  func.func @kernel(%arg0: i32, %arg1: memref<1x18x72xbf16, #tpu.memory_space<vmem>>, %arg2: memref<1x18x36xbf16, #tpu.memory_space<vmem>>, %arg3: memref<1x20x40xbf16, #tpu.memory_space<vmem>>, %arg4: memref<1x22x44xbf16, #tpu.memory_space<vmem>>, %arg5: memref<3x72x128xbf16, #tpu.memory_space<vmem>>, %arg6: memref<3x36x128xbf16, #tpu.memory_space<vmem>>, %arg7: memref<5x40x128xbf16, #tpu.memory_space<vmem>>, %arg8: memref<7x44x128xbf16, #tpu.memory_space<vmem>>, %arg9: memref<1x128xf32, #tpu.memory_space<vmem>>, %arg10: memref<1x16x128xf32, #tpu.memory_space<vmem>>) attributes {dimension_semantics = [#tpu.dimension_semantics<parallel>], iteration_bounds = array<i64: 2>, scalar_prefetch = 0 : i64, scratch_operands = 0 : i64, tpu.core_type = #tpu.core_type<tc>, window_params = [{transform_indices = @transform_0, window_bounds = array<i64: 1, 18, 72>}, {transform_indices = @transform_1, window_bounds = array<i64: 1, 18, 36>}, {transform_indices = @transform_2, window_bounds = array<i64: 1, 20, 40>}, {transform_indices = @transform_3, window_bounds = array<i64: 1, 22, 44>}, {pipeline_mode = #tpu.pipeline_mode<synchronous>, transform_indices = @transform_4, window_bounds = array<i64: 3, 72, 128>}, {pipeline_mode = #tpu.pipeline_mode<synchronous>, transform_indices = @transform_5, window_bounds = array<i64: 3, 36, 128>}, {pipeline_mode = #tpu.pipeline_mode<synchronous>, transform_indices = @transform_6, window_bounds = array<i64: 5, 40, 128>}, {pipeline_mode = #tpu.pipeline_mode<synchronous>, transform_indices = @transform_7, window_bounds = array<i64: 7, 44, 128>}, {pipeline_mode = #tpu.pipeline_mode<synchronous>, transform_indices = @transform_8, window_bounds = array<i64: 1, 128>}, {transform_indices = @transform_9, window_bounds = array<i64: 1, 16, 128>}]} {
    %cst = arith.constant 0.000000e+00 : f32
    %0 = vector.broadcast %cst : f32 to vector<16x128xf32>
    %c0 = arith.constant 0 : index
    %c0_0 = arith.constant 0 : index
    %c0_1 = arith.constant 0 : index
    %1 = vector.load %arg1[%c0, %c0_0, %c0_1] : memref<1x18x72xbf16, #tpu.memory_space<vmem>>, vector<1x16x72xbf16>
    %2 = vector.shape_cast %1 : vector<1x16x72xbf16> to vector<16x72xbf16>
    %c0_2 = arith.constant 0 : index
    %c0_3 = arith.constant 0 : index
    %c0_4 = arith.constant 0 : index
    %3 = vector.load %arg5[%c0_2, %c0_3, %c0_4] : memref<3x72x128xbf16, #tpu.memory_space<vmem>>, vector<1x72x128xbf16>
    %4 = vector.shape_cast %3 : vector<1x72x128xbf16> to vector<72x128xbf16>
    %cst_5 = arith.constant dense<0.000000e+00> : vector<16x128xf32>
    %5 = tpu.matmul %2, %4, %cst_5 {dimension_numbers = #tpu.dot_dimension_numbers<[1], [0], [0], [1], [0, 0, 1, 1], [], []>} : vector<16x72xbf16>, vector<72x128xbf16>, vector<16x128xf32> -> vector<16x128xf32>
    %6 = arith.addf %0, %5 : vector<16x128xf32>
    %c0_6 = arith.constant 0 : index
    %c1 = arith.constant 1 : index
    %c0_7 = arith.constant 0 : index
    %7 = vector.load %arg1[%c0_6, %c1, %c0_7] : memref<1x18x72xbf16, #tpu.memory_space<vmem>>, vector<1x16x72xbf16>
    %8 = vector.shape_cast %7 : vector<1x16x72xbf16> to vector<16x72xbf16>
    %c1_8 = arith.constant 1 : index
    %c0_9 = arith.constant 0 : index
    %c0_10 = arith.constant 0 : index
    %9 = vector.load %arg5[%c1_8, %c0_9, %c0_10] : memref<3x72x128xbf16, #tpu.memory_space<vmem>>, vector<1x72x128xbf16>
    %10 = vector.shape_cast %9 : vector<1x72x128xbf16> to vector<72x128xbf16>
    %cst_11 = arith.constant dense<0.000000e+00> : vector<16x128xf32>
    %11 = tpu.matmul %8, %10, %cst_11 {dimension_numbers = #tpu.dot_dimension_numbers<[1], [0], [0], [1], [0, 0, 1, 1], [], []>} : vector<16x72xbf16>, vector<72x128xbf16>, vector<16x128xf32> -> vector<16x128xf32>
    %12 = arith.addf %6, %11 : vector<16x128xf32>
    %c0_12 = arith.constant 0 : index
    %c2 = arith.constant 2 : index
    %c0_13 = arith.constant 0 : index
    %13 = vector.load %arg1[%c0_12, %c2, %c0_13] : memref<1x18x72xbf16, #tpu.memory_space<vmem>>, vector<1x16x72xbf16>
    %14 = vector.shape_cast %13 : vector<1x16x72xbf16> to vector<16x72xbf16>
    %c2_14 = arith.constant 2 : index
    %c0_15 = arith.constant 0 : index
    %c0_16 = arith.constant 0 : index
    %15 = vector.load %arg5[%c2_14, %c0_15, %c0_16] : memref<3x72x128xbf16, #tpu.memory_space<vmem>>, vector<1x72x128xbf16>
    %16 = vector.shape_cast %15 : vector<1x72x128xbf16> to vector<72x128xbf16>
    %cst_17 = arith.constant dense<0.000000e+00> : vector<16x128xf32>
    %17 = tpu.matmul %14, %16, %cst_17 {dimension_numbers = #tpu.dot_dimension_numbers<[1], [0], [0], [1], [0, 0, 1, 1], [], []>} : vector<16x72xbf16>, vector<72x128xbf16>, vector<16x128xf32> -> vector<16x128xf32>
    %18 = arith.addf %12, %17 : vector<16x128xf32>
    %c0_18 = arith.constant 0 : index
    %c0_19 = arith.constant 0 : index
    %c0_20 = arith.constant 0 : index
    %19 = vector.load %arg2[%c0_18, %c0_19, %c0_20] : memref<1x18x36xbf16, #tpu.memory_space<vmem>>, vector<1x16x36xbf16>
    %20 = vector.shape_cast %19 : vector<1x16x36xbf16> to vector<16x36xbf16>
    %c0_21 = arith.constant 0 : index
    %c0_22 = arith.constant 0 : index
    %c0_23 = arith.constant 0 : index
    %21 = vector.load %arg6[%c0_21, %c0_22, %c0_23] : memref<3x36x128xbf16, #tpu.memory_space<vmem>>, vector<1x36x128xbf16>
    %22 = vector.shape_cast %21 : vector<1x36x128xbf16> to vector<36x128xbf16>
    %cst_24 = arith.constant dense<0.000000e+00> : vector<16x128xf32>
    %23 = tpu.matmul %20, %22, %cst_24 {dimension_numbers = #tpu.dot_dimension_numbers<[1], [0], [0], [1], [0, 0, 1, 1], [], []>} : vector<16x36xbf16>, vector<36x128xbf16>, vector<16x128xf32> -> vector<16x128xf32>
    %24 = arith.addf %18, %23 : vector<16x128xf32>
    %c0_25 = arith.constant 0 : index
    %c1_26 = arith.constant 1 : index
    %c0_27 = arith.constant 0 : index
    %25 = vector.load %arg2[%c0_25, %c1_26, %c0_27] : memref<1x18x36xbf16, #tpu.memory_space<vmem>>, vector<1x16x36xbf16>
    %26 = vector.shape_cast %25 : vector<1x16x36xbf16> to vector<16x36xbf16>
    %c1_28 = arith.constant 1 : index
    %c0_29 = arith.constant 0 : index
    %c0_30 = arith.constant 0 : index
    %27 = vector.load %arg6[%c1_28, %c0_29, %c0_30] : memref<3x36x128xbf16, #tpu.memory_space<vmem>>, vector<1x36x128xbf16>
    %28 = vector.shape_cast %27 : vector<1x36x128xbf16> to vector<36x128xbf16>
    %cst_31 = arith.constant dense<0.000000e+00> : vector<16x128xf32>
    %29 = tpu.matmul %26, %28, %cst_31 {dimension_numbers = #tpu.dot_dimension_numbers<[1], [0], [0], [1], [0, 0, 1, 1], [], []>} : vector<16x36xbf16>, vector<36x128xbf16>, vector<16x128xf32> -> vector<16x128xf32>
    %30 = arith.addf %24, %29 : vector<16x128xf32>
    %c0_32 = arith.constant 0 : index
    %c2_33 = arith.constant 2 : index
    %c0_34 = arith.constant 0 : index
    %31 = vector.load %arg2[%c0_32, %c2_33, %c0_34] : memref<1x18x36xbf16, #tpu.memory_space<vmem>>, vector<1x16x36xbf16>
    %32 = vector.shape_cast %31 : vector<1x16x36xbf16> to vector<16x36xbf16>
    %c2_35 = arith.constant 2 : index
    %c0_36 = arith.constant 0 : index
    %c0_37 = arith.constant 0 : index
    %33 = vector.load %arg6[%c2_35, %c0_36, %c0_37] : memref<3x36x128xbf16, #tpu.memory_space<vmem>>, vector<1x36x128xbf16>
    %34 = vector.shape_cast %33 : vector<1x36x128xbf16> to vector<36x128xbf16>
    %cst_38 = arith.constant dense<0.000000e+00> : vector<16x128xf32>
    %35 = tpu.matmul %32, %34, %cst_38 {dimension_numbers = #tpu.dot_dimension_numbers<[1], [0], [0], [1], [0, 0, 1, 1], [], []>} : vector<16x36xbf16>, vector<36x128xbf16>, vector<16x128xf32> -> vector<16x128xf32>
    %36 = arith.addf %30, %35 : vector<16x128xf32>
    %c0_39 = arith.constant 0 : index
    %c0_40 = arith.constant 0 : index
    %c0_41 = arith.constant 0 : index
    %37 = vector.load %arg3[%c0_39, %c0_40, %c0_41] : memref<1x20x40xbf16, #tpu.memory_space<vmem>>, vector<1x16x40xbf16>
    %38 = vector.shape_cast %37 : vector<1x16x40xbf16> to vector<16x40xbf16>
    %c0_42 = arith.constant 0 : index
    %c0_43 = arith.constant 0 : index
    %c0_44 = arith.constant 0 : index
    %39 = vector.load %arg7[%c0_42, %c0_43, %c0_44] : memref<5x40x128xbf16, #tpu.memory_space<vmem>>, vector<1x40x128xbf16>
    %40 = vector.shape_cast %39 : vector<1x40x128xbf16> to vector<40x128xbf16>
    %cst_45 = arith.constant dense<0.000000e+00> : vector<16x128xf32>
    %41 = tpu.matmul %38, %40, %cst_45 {dimension_numbers = #tpu.dot_dimension_numbers<[1], [0], [0], [1], [0, 0, 1, 1], [], []>} : vector<16x40xbf16>, vector<40x128xbf16>, vector<16x128xf32> -> vector<16x128xf32>
    %42 = arith.addf %36, %41 : vector<16x128xf32>
    %c0_46 = arith.constant 0 : index
    %c1_47 = arith.constant 1 : index
    %c0_48 = arith.constant 0 : index
    %43 = vector.load %arg3[%c0_46, %c1_47, %c0_48] : memref<1x20x40xbf16, #tpu.memory_space<vmem>>, vector<1x16x40xbf16>
    %44 = vector.shape_cast %43 : vector<1x16x40xbf16> to vector<16x40xbf16>
    %c1_49 = arith.constant 1 : index
    %c0_50 = arith.constant 0 : index
    %c0_51 = arith.constant 0 : index
    %45 = vector.load %arg7[%c1_49, %c0_50, %c0_51] : memref<5x40x128xbf16, #tpu.memory_space<vmem>>, vector<1x40x128xbf16>
    %46 = vector.shape_cast %45 : vector<1x40x128xbf16> to vector<40x128xbf16>
    %cst_52 = arith.constant dense<0.000000e+00> : vector<16x128xf32>
    %47 = tpu.matmul %44, %46, %cst_52 {dimension_numbers = #tpu.dot_dimension_numbers<[1], [0], [0], [1], [0, 0, 1, 1], [], []>} : vector<16x40xbf16>, vector<40x128xbf16>, vector<16x128xf32> -> vector<16x128xf32>
    %48 = arith.addf %42, %47 : vector<16x128xf32>
    %c0_53 = arith.constant 0 : index
    %c2_54 = arith.constant 2 : index
    %c0_55 = arith.constant 0 : index
    %49 = vector.load %arg3[%c0_53, %c2_54, %c0_55] : memref<1x20x40xbf16, #tpu.memory_space<vmem>>, vector<1x16x40xbf16>
    %50 = vector.shape_cast %49 : vector<1x16x40xbf16> to vector<16x40xbf16>
    %c2_56 = arith.constant 2 : index
    %c0_57 = arith.constant 0 : index
    %c0_58 = arith.constant 0 : index
    %51 = vector.load %arg7[%c2_56, %c0_57, %c0_58] : memref<5x40x128xbf16, #tpu.memory_space<vmem>>, vector<1x40x128xbf16>
    %52 = vector.shape_cast %51 : vector<1x40x128xbf16> to vector<40x128xbf16>
    %cst_59 = arith.constant dense<0.000000e+00> : vector<16x128xf32>
    %53 = tpu.matmul %50, %52, %cst_59 {dimension_numbers = #tpu.dot_dimension_numbers<[1], [0], [0], [1], [0, 0, 1, 1], [], []>} : vector<16x40xbf16>, vector<40x128xbf16>, vector<16x128xf32> -> vector<16x128xf32>
    %54 = arith.addf %48, %53 : vector<16x128xf32>
    %c0_60 = arith.constant 0 : index
    %c3 = arith.constant 3 : index
    %c0_61 = arith.constant 0 : index
    %55 = vector.load %arg3[%c0_60, %c3, %c0_61] : memref<1x20x40xbf16, #tpu.memory_space<vmem>>, vector<1x16x40xbf16>
    %56 = vector.shape_cast %55 : vector<1x16x40xbf16> to vector<16x40xbf16>
    %c3_62 = arith.constant 3 : index
    %c0_63 = arith.constant 0 : index
    %c0_64 = arith.constant 0 : index
    %57 = vector.load %arg7[%c3_62, %c0_63, %c0_64] : memref<5x40x128xbf16, #tpu.memory_space<vmem>>, vector<1x40x128xbf16>
    %58 = vector.shape_cast %57 : vector<1x40x128xbf16> to vector<40x128xbf16>
    %cst_65 = arith.constant dense<0.000000e+00> : vector<16x128xf32>
    %59 = tpu.matmul %56, %58, %cst_65 {dimension_numbers = #tpu.dot_dimension_numbers<[1], [0], [0], [1], [0, 0, 1, 1], [], []>} : vector<16x40xbf16>, vector<40x128xbf16>, vector<16x128xf32> -> vector<16x128xf32>
    %60 = arith.addf %54, %59 : vector<16x128xf32>
    %c0_66 = arith.constant 0 : index
    %c4 = arith.constant 4 : index
    %c0_67 = arith.constant 0 : index
    %61 = vector.load %arg3[%c0_66, %c4, %c0_67] : memref<1x20x40xbf16, #tpu.memory_space<vmem>>, vector<1x16x40xbf16>
    %62 = vector.shape_cast %61 : vector<1x16x40xbf16> to vector<16x40xbf16>
    %c4_68 = arith.constant 4 : index
    %c0_69 = arith.constant 0 : index
    %c0_70 = arith.constant 0 : index
    %63 = vector.load %arg7[%c4_68, %c0_69, %c0_70] : memref<5x40x128xbf16, #tpu.memory_space<vmem>>, vector<1x40x128xbf16>
    %64 = vector.shape_cast %63 : vector<1x40x128xbf16> to vector<40x128xbf16>
    %cst_71 = arith.constant dense<0.000000e+00> : vector<16x128xf32>
    %65 = tpu.matmul %62, %64, %cst_71 {dimension_numbers = #tpu.dot_dimension_numbers<[1], [0], [0], [1], [0, 0, 1, 1], [], []>} : vector<16x40xbf16>, vector<40x128xbf16>, vector<16x128xf32> -> vector<16x128xf32>
    %66 = arith.addf %60, %65 : vector<16x128xf32>
    %c0_72 = arith.constant 0 : index
    %c0_73 = arith.constant 0 : index
    %c0_74 = arith.constant 0 : index
    %67 = vector.load %arg4[%c0_72, %c0_73, %c0_74] : memref<1x22x44xbf16, #tpu.memory_space<vmem>>, vector<1x16x44xbf16>
    %68 = vector.shape_cast %67 : vector<1x16x44xbf16> to vector<16x44xbf16>
    %c0_75 = arith.constant 0 : index
    %c0_76 = arith.constant 0 : index
    %c0_77 = arith.constant 0 : index
    %69 = vector.load %arg8[%c0_75, %c0_76, %c0_77] : memref<7x44x128xbf16, #tpu.memory_space<vmem>>, vector<1x44x128xbf16>
    %70 = vector.shape_cast %69 : vector<1x44x128xbf16> to vector<44x128xbf16>
    %cst_78 = arith.constant dense<0.000000e+00> : vector<16x128xf32>
    %71 = tpu.matmul %68, %70, %cst_78 {dimension_numbers = #tpu.dot_dimension_numbers<[1], [0], [0], [1], [0, 0, 1, 1], [], []>} : vector<16x44xbf16>, vector<44x128xbf16>, vector<16x128xf32> -> vector<16x128xf32>
    %72 = arith.addf %66, %71 : vector<16x128xf32>
    %c0_79 = arith.constant 0 : index
    %c1_80 = arith.constant 1 : index
    %c0_81 = arith.constant 0 : index
    %73 = vector.load %arg4[%c0_79, %c1_80, %c0_81] : memref<1x22x44xbf16, #tpu.memory_space<vmem>>, vector<1x16x44xbf16>
    %74 = vector.shape_cast %73 : vector<1x16x44xbf16> to vector<16x44xbf16>
    %c1_82 = arith.constant 1 : index
    %c0_83 = arith.constant 0 : index
    %c0_84 = arith.constant 0 : index
    %75 = vector.load %arg8[%c1_82, %c0_83, %c0_84] : memref<7x44x128xbf16, #tpu.memory_space<vmem>>, vector<1x44x128xbf16>
    %76 = vector.shape_cast %75 : vector<1x44x128xbf16> to vector<44x128xbf16>
    %cst_85 = arith.constant dense<0.000000e+00> : vector<16x128xf32>
    %77 = tpu.matmul %74, %76, %cst_85 {dimension_numbers = #tpu.dot_dimension_numbers<[1], [0], [0], [1], [0, 0, 1, 1], [], []>} : vector<16x44xbf16>, vector<44x128xbf16>, vector<16x128xf32> -> vector<16x128xf32>
    %78 = arith.addf %72, %77 : vector<16x128xf32>
    %c0_86 = arith.constant 0 : index
    %c2_87 = arith.constant 2 : index
    %c0_88 = arith.constant 0 : index
    %79 = vector.load %arg4[%c0_86, %c2_87, %c0_88] : memref<1x22x44xbf16, #tpu.memory_space<vmem>>, vector<1x16x44xbf16>
    %80 = vector.shape_cast %79 : vector<1x16x44xbf16> to vector<16x44xbf16>
    %c2_89 = arith.constant 2 : index
    %c0_90 = arith.constant 0 : index
    %c0_91 = arith.constant 0 : index
    %81 = vector.load %arg8[%c2_89, %c0_90, %c0_91] : memref<7x44x128xbf16, #tpu.memory_space<vmem>>, vector<1x44x128xbf16>
    %82 = vector.shape_cast %81 : vector<1x44x128xbf16> to vector<44x128xbf16>
    %cst_92 = arith.constant dense<0.000000e+00> : vector<16x128xf32>
    %83 = tpu.matmul %80, %82, %cst_92 {dimension_numbers = #tpu.dot_dimension_numbers<[1], [0], [0], [1], [0, 0, 1, 1], [], []>} : vector<16x44xbf16>, vector<44x128xbf16>, vector<16x128xf32> -> vector<16x128xf32>
    %84 = arith.addf %78, %83 : vector<16x128xf32>
    %c0_93 = arith.constant 0 : index
    %c3_94 = arith.constant 3 : index
    %c0_95 = arith.constant 0 : index
    %85 = vector.load %arg4[%c0_93, %c3_94, %c0_95] : memref<1x22x44xbf16, #tpu.memory_space<vmem>>, vector<1x16x44xbf16>
    %86 = vector.shape_cast %85 : vector<1x16x44xbf16> to vector<16x44xbf16>
    %c3_96 = arith.constant 3 : index
    %c0_97 = arith.constant 0 : index
    %c0_98 = arith.constant 0 : index
    %87 = vector.load %arg8[%c3_96, %c0_97, %c0_98] : memref<7x44x128xbf16, #tpu.memory_space<vmem>>, vector<1x44x128xbf16>
    %88 = vector.shape_cast %87 : vector<1x44x128xbf16> to vector<44x128xbf16>
    %cst_99 = arith.constant dense<0.000000e+00> : vector<16x128xf32>
    %89 = tpu.matmul %86, %88, %cst_99 {dimension_numbers = #tpu.dot_dimension_numbers<[1], [0], [0], [1], [0, 0, 1, 1], [], []>} : vector<16x44xbf16>, vector<44x128xbf16>, vector<16x128xf32> -> vector<16x128xf32>
    %90 = arith.addf %84, %89 : vector<16x128xf32>
    %c0_100 = arith.constant 0 : index
    %c4_101 = arith.constant 4 : index
    %c0_102 = arith.constant 0 : index
    %91 = vector.load %arg4[%c0_100, %c4_101, %c0_102] : memref<1x22x44xbf16, #tpu.memory_space<vmem>>, vector<1x16x44xbf16>
    %92 = vector.shape_cast %91 : vector<1x16x44xbf16> to vector<16x44xbf16>
    %c4_103 = arith.constant 4 : index
    %c0_104 = arith.constant 0 : index
    %c0_105 = arith.constant 0 : index
    %93 = vector.load %arg8[%c4_103, %c0_104, %c0_105] : memref<7x44x128xbf16, #tpu.memory_space<vmem>>, vector<1x44x128xbf16>
    %94 = vector.shape_cast %93 : vector<1x44x128xbf16> to vector<44x128xbf16>
    %cst_106 = arith.constant dense<0.000000e+00> : vector<16x128xf32>
    %95 = tpu.matmul %92, %94, %cst_106 {dimension_numbers = #tpu.dot_dimension_numbers<[1], [0], [0], [1], [0, 0, 1, 1], [], []>} : vector<16x44xbf16>, vector<44x128xbf16>, vector<16x128xf32> -> vector<16x128xf32>
    %96 = arith.addf %90, %95 : vector<16x128xf32>
    %c0_107 = arith.constant 0 : index
    %c5 = arith.constant 5 : index
    %c0_108 = arith.constant 0 : index
    %97 = vector.load %arg4[%c0_107, %c5, %c0_108] : memref<1x22x44xbf16, #tpu.memory_space<vmem>>, vector<1x16x44xbf16>
    %98 = vector.shape_cast %97 : vector<1x16x44xbf16> to vector<16x44xbf16>
    %c5_109 = arith.constant 5 : index
    %c0_110 = arith.constant 0 : index
    %c0_111 = arith.constant 0 : index
    %99 = vector.load %arg8[%c5_109, %c0_110, %c0_111] : memref<7x44x128xbf16, #tpu.memory_space<vmem>>, vector<1x44x128xbf16>
    %100 = vector.shape_cast %99 : vector<1x44x128xbf16> to vector<44x128xbf16>
    %cst_112 = arith.constant dense<0.000000e+00> : vector<16x128xf32>
    %101 = tpu.matmul %98, %100, %cst_112 {dimension_numbers = #tpu.dot_dimension_numbers<[1], [0], [0], [1], [0, 0, 1, 1], [], []>} : vector<16x44xbf16>, vector<44x128xbf16>, vector<16x128xf32> -> vector<16x128xf32>
    %102 = arith.addf %96, %101 : vector<16x128xf32>
    %c0_113 = arith.constant 0 : index
    %c6 = arith.constant 6 : index
    %c0_114 = arith.constant 0 : index
    %103 = vector.load %arg4[%c0_113, %c6, %c0_114] : memref<1x22x44xbf16, #tpu.memory_space<vmem>>, vector<1x16x44xbf16>
    %104 = vector.shape_cast %103 : vector<1x16x44xbf16> to vector<16x44xbf16>
    %c6_115 = arith.constant 6 : index
    %c0_116 = arith.constant 0 : index
    %c0_117 = arith.constant 0 : index
    %105 = vector.load %arg8[%c6_115, %c0_116, %c0_117] : memref<7x44x128xbf16, #tpu.memory_space<vmem>>, vector<1x44x128xbf16>
    %106 = vector.shape_cast %105 : vector<1x44x128xbf16> to vector<44x128xbf16>
    %cst_118 = arith.constant dense<0.000000e+00> : vector<16x128xf32>
    %107 = tpu.matmul %104, %106, %cst_118 {dimension_numbers = #tpu.dot_dimension_numbers<[1], [0], [0], [1], [0, 0, 1, 1], [], []>} : vector<16x44xbf16>, vector<44x128xbf16>, vector<16x128xf32> -> vector<16x128xf32>
    %108 = arith.addf %102, %107 : vector<16x128xf32>
    %c0_119 = arith.constant 0 : index
    %c0_120 = arith.constant 0 : index
    %109 = vector.load %arg9[%c0_119, %c0_120] : memref<1x128xf32, #tpu.memory_space<vmem>>, vector<1x128xf32>
    %110 = vector.broadcast %109 : vector<1x128xf32> to vector<16x128xf32>
    %111 = arith.addf %108, %110 : vector<16x128xf32>
    %cst_121 = arith.constant 0.000000e+00 : f32
    %112 = vector.broadcast %cst_121 : f32 to vector<16x128xf32>
    %113 = arith.maximumf %111, %112 : vector<16x128xf32>
    %c0_122 = arith.constant 0 : index
    %c0_123 = arith.constant 0 : index
    %c0_124 = arith.constant 0 : index
    %114 = vector.load %arg10[%c0_122, %c0_123, %c0_124] : memref<1x16x128xf32, #tpu.memory_space<vmem>>, vector<1x16x128xf32>
    %115 = vector.shape_cast %114 : vector<1x16x128xf32> to vector<16x128xf32>
    %116 = vector.shape_cast %113 : vector<16x128xf32> to vector<1x16x128xf32>
    tpu.vector_store %arg10[%c0_122, %c0_123, %c0_124], %116 {strides = array<i32>} : memref<1x16x128xf32, #tpu.memory_space<vmem>>, vector<1x16x128xf32>,
    return
  }
  func.func @transform_0(%arg0: i32) -> (i32, i32, i32) {
    %c0_i32 = arith.constant 0 : i32
    %c0_i32_0 = arith.constant 0 : i32
    %c0_i32_1 = arith.constant 0 : i32
    return %arg0, %c0_i32, %c0_i32_0 : i32, i32, i32
  }
  func.func @transform_1(%arg0: i32) -> (i32, i32, i32) {
    %c0_i32 = arith.constant 0 : i32
    %c0_i32_0 = arith.constant 0 : i32
    %c0_i32_1 = arith.constant 0 : i32
    return %arg0, %c0_i32, %c0_i32_0 : i32, i32, i32
  }
  func.func @transform_2(%arg0: i32) -> (i32, i32, i32) {
    %c0_i32 = arith.constant 0 : i32
    %c0_i32_0 = arith.constant 0 : i32
    %c0_i32_1 = arith.constant 0 : i32
    return %arg0, %c0_i32, %c0_i32_0 : i32, i32, i32
  }
  func.func @transform_3(%arg0: i32) -> (i32, i32, i32) {
    %c0_i32 = arith.constant 0 : i32
    %c0_i32_0 = arith.constant 0 : i32
    %c0_i32_1 = arith.constant 0 : i32
    return %arg0, %c0_i32, %c0_i32_0 : i32, i32, i32
  }
  func.func @transform_4(%arg0: i32) -> (i32, i32, i32) {
    %c0_i32 = arith.constant 0 : i32
    %c0_i32_0 = arith.constant 0 : i32
    %c0_i32_1 = arith.constant 0 : i32
    %c0_i32_2 = arith.constant 0 : i32
    return %c0_i32, %c0_i32_0, %c0_i32_1 : i32, i32, i32
  }
  func.func @transform_5(%arg0: i32) -> (i32, i32, i32) {
    %c0_i32 = arith.constant 0 : i32
    %c0_i32_0 = arith.constant 0 : i32
    %c0_i32_1 = arith.constant 0 : i32
    %c0_i32_2 = arith.constant 0 : i32
    return %c0_i32, %c0_i32_0, %c0_i32_1 : i32, i32, i32
  }
  func.func @transform_6(%arg0: i32) -> (i32, i32, i32) {
    %c0_i32 = arith.constant 0 : i32
    %c0_i32_0 = arith.constant 0 : i32
    %c0_i32_1 = arith.constant 0 : i32
    %c0_i32_2 = arith.constant 0 : i32
    return %c0_i32, %c0_i32_0, %c0_i32_1 : i32, i32, i32
  }
  func.func @transform_7(%arg0: i32) -> (i32, i32, i32) {
    %c0_i32 = arith.constant 0 : i32
    %c0_i32_0 = arith.constant 0 : i32
    %c0_i32_1 = arith.constant 0 : i32
    %c0_i32_2 = arith.constant 0 : i32
    return %c0_i32, %c0_i32_0, %c0_i32_1 : i32, i32, i32
  }
  func.func @transform_8(%arg0: i32) -> (i32, i32) {
    %c0_i32 = arith.constant 0 : i32
    %c0_i32_0 = arith.constant 0 : i32
    %c0_i32_1 = arith.constant 0 : i32
    return %c0_i32, %c0_i32_0 : i32, i32
  }
  func.func @transform_9(%arg0: i32) -> (i32, i32, i32) {
    %c0_i32 = arith.constant 0 : i32
    %c0_i32_0 = arith.constant 0 : i32
    %c0_i32_1 = arith.constant 0 : i32
    return %arg0, %c0_i32, %c0_i32_0 : i32, i32, i32
  }
}

</mosaic_0001>

<bundles_post_ra>
// kernel: tile.13
= control target key start
LH: loop header
LB: loop body
LE: loop exit
PB: predicated region body
PF: predicated region fallthrough
CT: control target
= control target key end

     0   :  { %s28_s0 = inlined_call_operand.vmem [shape: f32[6], index: 0, kind: input, shape index: {}]   ;;  %s29_s1 = inlined_call_operand.vmem [shape: f32[16,6], index: 1, kind: output, shape index: {}]  }
   0x1   :  { %v4_v0 = vld [vmem:[%s28_s0] ss:$0 sm:$0xff] }
   0x2   :  { %5 = vst [vmem:[%s29_s1] sm:$0xff] %v4_v0 }
   0x3   :  { %8 = vst [vmem:[%s29_s1 + $0x8] sm:$0xff] %v4_v0 }

// kernel: tile.14
= control target key start
LH: loop header
LB: loop body
LE: loop exit
PB: predicated region body
PF: predicated region fallthrough
CT: control target
= control target key end

     0   :  { %s131_s10 = smov 90   ;;  %s132_s11 = smov 78   ;;  %vm3_vm0 = vcmask 48128   ;;  %vm9_vm1 = vcmask 786128   ;;  %vm15_vm2 = vcmask 736928   ;;  %vm21_vm3 = vcmask 687728   ;;  %s207_s0 = inlined_call_operand.vmem [shape: f32[16,6], index: 0, kind: input, shape index: {}]   ;;  %s208_s1 = inlined_call_operand.vmem [shape: f32[1,96], index: 1, kind: output, shape index: {}]  }
   0x1   :  { %v101_v0 = vld [vmem:[%s207_s0 + $0xf] sm:$0x1]   ;;  %v103_v1 = vld [vmem:[%s207_s0 + $0xd] sm:$0x1]   ;;  %v105_v2 = vld [vmem:[%s207_s0 + $0xb] sm:$0x1]  }
   0x2   :  { %7 = vrot.lane.b32.xlu0 %v101_v0, %s131_s10  ;;  %19 = vrot.lane.b32.xlu1 %v103_v1, %s132_s11  ;;  %s133_s14 = smov 66   ;;  %v102_v3 = vld [vmem:[%s207_s0 + $0xe] sm:$0x1]   ;;  %v104_v4 = vld [vmem:[%s207_s0 + $0xc] sm:$0x1]   ;;  %s134_s19 = smov 84  }
   0x3   :  { %31 = vrot.lane.b32.xlu2 %v105_v2, %s133_s14  ;;  %s135_s20 = smov 72   ;;  %v106_v5 = vld [vmem:[%s207_s0 + $0xa] sm:$0x1]   ;;  %s136_s23 = smov 60   ;;  %v107_v6 = vld [vmem:[%s207_s0 + $0x9] sm:$0x1]  }
   0x4   :  { %v108_v7 = vld [vmem:[%s207_s0 + $0x8] sm:$0x1]   ;;  %s137_s28 = smov 54   ;;  %s138_s29 = smov 48   ;;  %v109_v8 = vld [vmem:[%s207_s0 + $0x7] sm:$0x1]  }
   0x5   :  { %s139_s3 = smov 42   ;;  %v110_v9 = vld [vmem:[%s207_s0 + $0x6] sm:$0x1]   ;;  %v111_v10 = vld [vmem:[%s207_s0 + $0x5] sm:$0x1]   ;;  %s140_s8 = smov 36  }
   0x6   :  { %s141_s9 = smov 30   ;;  %v112_v11 = vld [vmem:[%s207_s0 + $0x4] sm:$0x1]   ;;  %s142_s12 = smov 24   ;;  %v113_v12 = vld [vmem:[%s207_s0 + $0x3] sm:$0x1]  }
   0x7   :  { %v114_v13 = vld [vmem:[%s207_s0 + $0x2] sm:$0x1]   ;;  %s143_s17 = smov 18   ;;  %s144_s18 = smov 12   ;;  %v115_v14 = vld [vmem:[%s207_s0 + $0x1] sm:$0x1]  }
   0x8   :  { %s145_s21 = smov 6   ;;  %v2_v15 = vld [vmem:[%s207_s0] sm:$0x1]   ;;  %vm27_vm4 = vcmask 638528   ;;  %vm33_vm5 = vcmask 589328   ;;  %vm39_vm6 = vcmask 540128  }
   0x9   :  { %4 = vst.msk [vmem:[#allocation0] sm:$0x1] %vm3_vm0, %v2_v15   ;;  %vm45_vm7 = vcmask 490928   ;;  %vm51_vm8 = vcmask 441728   ;;  %vm57_vm9 = vcmask 392528   ;;  %vm63_vm10 = vcmask 343328  }
   0xa   :  { %13 = vrot.lane.b32.xlu0 %v102_v3, %s134_s19  ;;  %25 = vrot.lane.b32.xlu1 %v104_v4, %s135_s20  ;;  %vm69_vm11 = vcmask 294128   ;;  %vm75_vm12 = vcmask 244928   ;;  %vm81_vm13 = vcmask 195728   ;;  %vm87_vm14 = vcmask 146528  }
   0xb   :  { %37 = vrot.lane.b32.xlu2 %v106_v5, %s136_s23  ;;  %vm93_vm15 = vcmask 97328  }
  0x12   :  { %43 = vrot.lane.b32.xlu0 %v107_v6, %s137_s28  ;;  %49 = vrot.lane.b32.xlu1 %v108_v7, %s138_s29 }
  0x13   :  { %55 = vrot.lane.b32.xlu2 %v109_v8, %s139_s3 }
  0x1a   :  { %61 = vrot.lane.b32.xlu0 %v110_v9, %s140_s8  ;;  %67 = vrot.lane.b32.xlu1 %v111_v10, %s141_s9 }
  0x1b   :  { %73 = vrot.lane.b32.xlu2 %v112_v11, %s142_s12 }
  0x22   :  { %79 = vrot.lane.b32.xlu0 %v113_v12, %s143_s17  ;;  %85 = vrot.lane.b32.xlu1 %v114_v13, %s144_s18 }
  0x23   :  { %91 = vrot.lane.b32.xlu2 %v115_v14, %s145_s21 }
  0x5d   :  { %v32_v16 = vpop.permute.xlu2 %31  }
  0x65   :  { %v38_v17 = vpop.permute.xlu2 %37  }
  0x6d   :  { %v56_v18 = vpop.permute.xlu2 %55  }
  0x74   :  { %v8_v19 = vpop.permute.xlu0 %7   ;;  %v20_v20 = vpop.permute.xlu1 %19  }
  0x75   :  { %10 = vst.msk [vmem:[#allocation0] sm:$0x1] %vm9_vm1, %v8_v19   ;;  %v74_v21 = vpop.permute.xlu2 %73  }
  0x7c   :  { %v14_v22 = vpop.permute.xlu0 %13   ;;  %v26_v23 = vpop.permute.xlu1 %25  }
  0x7d   :  { %16 = vst.msk [vmem:[#allocation0] sm:$0x1] %vm15_vm2, %v14_v22   ;;  %v92_v24 = vpop.permute.xlu2 %91  }
  0x7e   :  { %22 = vst.msk [vmem:[#allocation0] sm:$0x1] %vm21_vm3, %v20_v20  }
  0x7f   :  { %28 = vst.msk [vmem:[#allocation0] sm:$0x1] %vm27_vm4, %v26_v23  }
  0x80   :  { %34 = vst.msk [vmem:[#allocation0] sm:$0x1] %vm33_vm5, %v32_v16  }
  0x81   :  { %40 = vst.msk [vmem:[#allocation0] sm:$0x1] %vm39_vm6, %v38_v17  }
  0x84   :  { %v44_v25 = vpop.permute.xlu0 %43   ;;  %v50_v26 = vpop.permute.xlu1 %49  }
  0x85   :  { %46 = vst.msk [vmem:[#allocation0] sm:$0x1] %vm45_vm7, %v44_v25  }
  0x86   :  { %52 = vst.msk [vmem:[#allocation0] sm:$0x1] %vm51_vm8, %v50_v26  }
  0x87   :  { %58 = vst.msk [vmem:[#allocation0] sm:$0x1] %vm57_vm9, %v56_v18  }
  0x8c   :  { %v62_v27 = vpop.permute.xlu0 %61   ;;  %v68_v28 = vpop.permute.xlu1 %67  }
  0x8d   :  { %64 = vst.msk [vmem:[#allocation0] sm:$0x1] %vm63_vm10, %v62_v27  }
  0x8e   :  { %70 = vst.msk [vmem:[#allocation0] sm:$0x1] %vm69_vm11, %v68_v28  }
  0x8f   :  { %76 = vst.msk [vmem:[#allocation0] sm:$0x1] %vm75_vm12, %v74_v21  }
  0x94   :  { %v80_v29 = vpop.permute.xlu0 %79   ;;  %v86_v30 = vpop.permute.xlu1 %85  }
  0x95   :  { %82 = vst.msk [vmem:[#allocation0] sm:$0x1] %vm81_vm13, %v80_v29  }
  0x96   :  { %88 = vst.msk [vmem:[#allocation0] sm:$0x1] %vm87_vm14, %v86_v30  }
  0x97   :  { %94 = vst.msk [vmem:[#allocation0] sm:$0x1] %vm93_vm15, %v92_v24  }
  0x9e   :  { %v97_v31 = vld [vmem:[#allocation0] sm:$0x1] }
  0x9f   :  { %100 = vst [vmem:[%s208_s1] sm:$0x1] %v97_v31 }

// kernel: conv_scale_forward.2
= control target key start
LH: loop header
LB: loop body
LE: loop exit
PB: predicated region body
PF: predicated region fallthrough
CT: control target
= control target key end

     0   :  { %s580_s12 = smov 0   ;;  %s649_s0 = inlined_call_operand.vmem [shape: bf16[2,18,72], index: 0, kind: input, shape index: {}]   ;;  %s650_s1 = inlined_call_operand.vmem [shape: bf16[3,72,96], index: 1, kind: input, shape index: {}]   ;;  %s651_s2 = inlined_call_operand.vmem [shape: f32[1,96], index: 2, kind: input, shape index: {}]   ;;  %s652_s3 = inlined_call_operand.vmem [shape: bf16[2,16,96], index: 3, kind: output, shape index: {}]  }
   0x1 LB: > { %s443_s13 = sadd.s32 4294967295, %s558_s12   ;;  %p447_p0 = scmp.ge.s32.totalorder %s558_s12, 1  ;;  %s558_s12 = sphi %s580_s12, %s13_s12  }
   0x2   : > { %p137_p1 = scmp.lt.s32.totalorder %s558_s12, 3 }
   0x4   : > { %p138_p2 = pnand %p447_p0, %p137_p1 }
   0x5   : > { %p161_p3 = scmp.lt.s32.totalorder (!%p138_p2), %s443_s13, 1 }
   0x6   : > { %141 = sbr.rel (%p138_p2) target bundleno = 184 (0xb8), region = 32 }
   0xb   : > { %v459_v0 = vld [vmem:[%s650_s1 + $0x44] sm:$0xf]  ;;  %v182_v1 = vld [vmem:[%s650_s1 + $0x20] sm:$0xf]  ;;  %v502_v4 = vld [vmem:[%s650_s1 + $0x68] sm:$0xf] }
   0xc   : > { %v232_v2 = vunpack.c.l.b16 %v459_v0  ;;  %v281_v3 = vunpack.c.l.b16 %v182_v1  ;;  %vm246_vm0 = vcmask 1043456   ;;  %v345_v5 = vunpack.c.l.b16 %v502_v4  ;;  %s654_s13 = smov (!%p161_p3, %s443_s13), 1  ;;  %v530_v12 = vld [vmem:[%s650_s1 + $0x3c] sm:$0xff]  ;;  %v529_v18 = vld [vmem:[%s650_s1 + $0x34] sm:$0xff]  ;;  %v528_v25 = vld [vmem:[%s650_s1 + $0x2c] sm:$0xff] }
   0xd   : > { %s542_s20 = smul.u32 12, %s654_s13  ;;  %v526_v13 = vld [vmem:[%s650_s1 + $0x18] sm:$0xff]  ;;  %v534_v14 = vld [vmem:[%s650_s1 + $0x60] sm:$0xff]  ;;  %v525_v19 = vld [vmem:[%s650_s1 + $0x10] sm:$0xff]  ;;  %vm202_vm1 = vsmask.f32 7424 }
   0xe   : > { %v237_v6 = vpack.c.b16 %v232_v2, %v232_v2  ;;  %v286_v7 = vpack.c.b16 %v281_v3, %v281_v3  ;;  %v350_v8 = vpack.c.b16 %v345_v5, %v345_v5  ;;  %v533_v21 = vld [vmem:[%s650_s1 + $0x58] sm:$0xff]  ;;  %v524_v26 = vld [vmem:[%s650_s1 + $0x8] sm:$0xff]  ;;  %v532_v30 = vld [vmem:[%s650_s1 + $0x50] sm:$0xff]  ;;  %vm324_vm2 = vcmask 1046528   ;;  %s522_s25 = sshll.u32 %s654_s13, 3 }
   0xf   : > { %s165_s29 = scalar_lea.vmem %s649_s0, %s542_s20  ;;  %v527_v32 = vld [vmem:[%s650_s1 + $0x24] sm:$0xff]  ;;  %vm242_vm3 = vcmask 588800   ;;  %v551_v44 = vld [vmem:[%s651_s2] ss:$0 sm:$0xff]  ;;  %s170_s28 = scalar_lea.vmem %s652_s3, %s522_s25  ;;  %vm385_vm4 = vcmask 781312  }
  0x10   : > { %v248_v9 = vsel %vm246_vm0, %v237_v6, 0  ;;  %v294_v10 = vsel %vm246_vm0, %v286_v7, 0  ;;  %v359_v11 = vsel %vm246_vm0, %v350_v8, 0  ;;  %v536_v15 = vld [vmem:[%s165_s29] sm:$0xff]   ;;  %v183_v16 = vld [vmem:[%s165_s29 + $0x8] sm:$0x1] }
  0x11   : > { %253 = vmatpush.bf16.msra.mxu0 %v248_v9  ;;  %299 = vmatpush.bf16.msra.mxu1 %v294_v10  ;;  %v199_v17 = vunpack.c.l.b16 %v183_v16  ;;  %v206_v20 = vshll.u32 %v536_v15, 16  ;;  %v539_v23 = vld [vmem:[%s165_s29] sm:$0xf0]  ;;  %v540_v24 = vld [vmem:[%s165_s29] sm:$0xe]  ;;  %v204_v27 = vshrl.u32 %v536_v15, 16 }
  0x12   : > { %364 = vmatpush.bf16.msra.mxu2 %v359_v11  ;;  %v541_v31 = vor.u32 %v540_v24, %v539_v23  ;;  %v523_v33 = vld [vmem:[%s650_s1] sm:$0xff]  ;;  %v531_v36 = vld [vmem:[%s650_s1 + $0x48] sm:$0xff] }
  0x13   : > { %v201_v22 = vpack.c.b16 %v199_v17, %v199_v17  ;;  %v208_v28 = vrot.slane %v206_v20, 1 }
  0x14   : > { %v325_v37 = vrot.slane %v541_v31, 1 }
  0x15   : > { %254 = vmatpush.bf16.msra.mxu0 %v530_v12  ;;  %300 = vmatpush.bf16.msra.mxu1 %v526_v13  ;;  %v211_v29 = vshll.u32 %v201_v22, 16  ;;  %v209_v34 = vor.u32 %v208_v28, %v204_v27  ;;  %v326_v38 = vrot.slane %v201_v22, 1 }
  0x16   : > { %365 = vmatpush.bf16.msra.mxu2 %v534_v14 }
  0x17   : > { %v213_v35 = vrot.slane %v211_v29, 1  ;;  %v327_v40 = vsel %vm324_vm2, %v325_v37, %v326_v38 }
  0x19   : > { %255 = vmatpush.bf16.msra.mxu0 %v529_v18  ;;  %301 = vmatpush.bf16.msra.mxu1 %v525_v19  ;;  %v214_v39 = vsel %vm202_vm1, %v209_v34, %v213_v35 }
  0x1a   : > { %366 = vmatpush.bf16.msra.mxu2 %v533_v21 }
  0x1d   : > { %256 = vmatpush.bf16.msra.mxu0 %v528_v25  ;;  %302 = vmatpush.bf16.msra.mxu1 %v524_v26 }
  0x1e   : > { %367 = vmatpush.bf16.msra.mxu2 %v532_v30 }
  0x21   : > { %257 = vmatpush.bf16.msra.mxu0 %v527_v32  ;;  %303 = vmatpush.bf16.msra.mxu1 %v523_v33 }
  0x22   : > { %368 = vmatpush.bf16.msra.mxu2 %v531_v36 }
  0x24   : > { %476 = vmatmul.msk.bf16.vlgmr.msra.gmra.mxu0 %vm242_vm3, %v214_v39  ;;  %493 = vmatmul.msk.bf16.vlgmr.msra.gmra.mxu1 %vm242_vm3, %v536_v15 }
  0x25   : > { %519 = vmatmul.msk.bf16.vlgmr.msra.gmra.mxu2 %vm242_vm3, %v327_v40 }
  0xa1   : > { %v259_v41 = vpop.f32.mrf.mxu0  ;;  %v305_v42 = vpop.f32.mrf.mxu1 }
  0xa2   : > { %v306_v43 = vadd.f32 %v305_v42, %v259_v41 }
  0xa8   : > { %v370_v45 = vpop.f32.mrf.mxu2 }
  0xa9   : > { %v375_v46 = vadd.f32 %v370_v45, %v306_v43  ;;  %v261_v48 = vpop.f32.mrf.mxu0  ;;  %v307_v49 = vpop.f32.mrf.mxu1 }
  0xaa   : > { %v308_v51 = vadd.f32 %v307_v49, %v261_v48 }
  0xab   : > { %v381_v47 = vadd.f32 %v551_v44, %v375_v46 }
  0xad   : > { %v383_v50 = vpack.c.bf16 %v381_v47, %v381_v47 }
  0xaf   : > { %386 = vst.msk [vmem:[%s170_s28] sm:$0xf] %vm385_vm4, %v383_v50 }
  0xb0   : > { %v372_v52 = vpop.f32.mrf.mxu2 }
  0xb1   : > { %v376_v53 = vadd.f32 %v372_v52, %v308_v51 }
  0xb3   : > { %v382_v54 = vadd.f32 %v551_v44, %v376_v53 }
  0xb5   : > { %v384_v55 = vpack.c.bf16 %v382_v54, %v382_v54 }
  0xb7   : > { %387 = vst.msk [vmem:[%s170_s28 + $0x4] sm:$0xf] %vm385_vm4, %v384_v55 }
  0xb8 PF: > { %s13_s12 = sadd.s32 1, %s558_s12  }
  0xb9   : > { %p10_p4 = scmp.ge.s32.totalorder %s13_s12, 4  }
  0xbb   :  { %12 = sbr.rel (!%p10_p4) target bundleno = 1 (0x1), region = 64 }

// kernel: tile.19
= control target key start
LH: loop header
LB: loop body
LE: loop exit
PB: predicated region body
PF: predicated region fallthrough
CT: control target
= control target key end

     0   :  { %s131_s10 = smov 120   ;;  %s132_s11 = smov 104   ;;  %vm3_vm0 = vcmask 64512   ;;  %vm9_vm1 = vcmask 1048512   ;;  %vm15_vm2 = vcmask 982912   ;;  %vm21_vm3 = vcmask 917312   ;;  %s207_s0 = inlined_call_operand.vmem [shape: f32[16,8], index: 0, kind: input, shape index: {}]   ;;  %s208_s1 = inlined_call_operand.vmem [shape: f32[1,128], index: 1, kind: output, shape index: {}]  }
   0x1   :  { %v101_v0 = vld [vmem:[%s207_s0 + $0xf] sm:$0x1]   ;;  %v103_v1 = vld [vmem:[%s207_s0 + $0xd] sm:$0x1]   ;;  %v105_v2 = vld [vmem:[%s207_s0 + $0xb] sm:$0x1]  }
   0x2   :  { %7 = vrot.lane.b32.xlu0 %v101_v0, %s131_s10  ;;  %19 = vrot.lane.b32.xlu1 %v103_v1, %s132_s11  ;;  %s133_s14 = smov 88   ;;  %v102_v3 = vld [vmem:[%s207_s0 + $0xe] sm:$0x1]   ;;  %v104_v4 = vld [vmem:[%s207_s0 + $0xc] sm:$0x1]   ;;  %s134_s19 = smov 112  }
   0x3   :  { %31 = vrot.lane.b32.xlu2 %v105_v2, %s133_s14  ;;  %s135_s20 = smov 96   ;;  %v106_v5 = vld [vmem:[%s207_s0 + $0xa] sm:$0x1]   ;;  %s136_s23 = smov 80   ;;  %v107_v6 = vld [vmem:[%s207_s0 + $0x9] sm:$0x1]  }
   0x4   :  { %v108_v7 = vld [vmem:[%s207_s0 + $0x8] sm:$0x1]   ;;  %s137_s28 = smov 72   ;;  %s138_s29 = smov 64   ;;  %v109_v8 = vld [vmem:[%s207_s0 + $0x7] sm:$0x1]  }
   0x5   :  { %s139_s3 = smov 56   ;;  %v110_v9 = vld [vmem:[%s207_s0 + $0x6] sm:$0x1]   ;;  %v111_v10 = vld [vmem:[%s207_s0 + $0x5] sm:$0x1]   ;;  %s140_s8 = smov 48  }
   0x6   :  { %s141_s9 = smov 40   ;;  %v112_v11 = vld [vmem:[%s207_s0 + $0x4] sm:$0x1]   ;;  %s142_s12 = smov 32   ;;  %v113_v12 = vld [vmem:[%s207_s0 + $0x3] sm:$0x1]  }
   0x7   :  { %v114_v13 = vld [vmem:[%s207_s0 + $0x2] sm:$0x1]   ;;  %s143_s17 = smov 24   ;;  %s144_s18 = smov 16   ;;  %v115_v14 = vld [vmem:[%s207_s0 + $0x1] sm:$0x1]  }
   0x8   :  { %s145_s21 = smov 8   ;;  %v2_v15 = vld [vmem:[%s207_s0] sm:$0x1]   ;;  %vm27_vm4 = vcmask 851712   ;;  %vm33_vm5 = vcmask 786112   ;;  %vm39_vm6 = vcmask 720512  }
   0x9   :  { %4 = vst.msk [vmem:[#allocation0] sm:$0x1] %vm3_vm0, %v2_v15   ;;  %vm45_vm7 = vcmask 654912   ;;  %vm51_vm8 = vcmask 589312   ;;  %vm57_vm9 = vcmask 523712   ;;  %vm63_vm10 = vcmask 458112  }
   0xa   :  { %13 = vrot.lane.b32.xlu0 %v102_v3, %s134_s19  ;;  %25 = vrot.lane.b32.xlu1 %v104_v4, %s135_s20  ;;  %vm69_vm11 = vcmask 392512   ;;  %vm75_vm12 = vcmask 326912   ;;  %vm81_vm13 = vcmask 261312   ;;  %vm87_vm14 = vcmask 195712  }
   0xb   :  { %37 = vrot.lane.b32.xlu2 %v106_v5, %s136_s23  ;;  %vm93_vm15 = vcmask 130112  }
  0x12   :  { %43 = vrot.lane.b32.xlu0 %v107_v6, %s137_s28  ;;  %49 = vrot.lane.b32.xlu1 %v108_v7, %s138_s29 }
  0x13   :  { %55 = vrot.lane.b32.xlu2 %v109_v8, %s139_s3 }
  0x1a   :  { %61 = vrot.lane.b32.xlu0 %v110_v9, %s140_s8  ;;  %67 = vrot.lane.b32.xlu1 %v111_v10, %s141_s9 }
  0x1b   :  { %73 = vrot.lane.b32.xlu2 %v112_v11, %s142_s12 }
  0x22   :  { %79 = vrot.lane.b32.xlu0 %v113_v12, %s143_s17  ;;  %85 = vrot.lane.b32.xlu1 %v114_v13, %s144_s18 }
  0x23   :  { %91 = vrot.lane.b32.xlu2 %v115_v14, %s145_s21 }
  0x5d   :  { %v32_v16 = vpop.permute.xlu2 %31  }
  0x65   :  { %v38_v17 = vpop.permute.xlu2 %37  }
  0x6d   :  { %v56_v18 = vpop.permute.xlu2 %55  }
  0x74   :  { %v8_v19 = vpop.permute.xlu0 %7   ;;  %v20_v20 = vpop.permute.xlu1 %19  }
  0x75   :  { %10 = vst.msk [vmem:[#allocation0] sm:$0x1] %vm9_vm1, %v8_v19   ;;  %v74_v21 = vpop.permute.xlu2 %73  }
  0x7c   :  { %v14_v22 = vpop.permute.xlu0 %13   ;;  %v26_v23 = vpop.permute.xlu1 %25  }
  0x7d   :  { %16 = vst.msk [vmem:[#allocation0] sm:$0x1] %vm15_vm2, %v14_v22   ;;  %v92_v24 = vpop.permute.xlu2 %91  }
  0x7e   :  { %22 = vst.msk [vmem:[#allocation0] sm:$0x1] %vm21_vm3, %v20_v20  }
  0x7f   :  { %28 = vst.msk [vmem:[#allocation0] sm:$0x1] %vm27_vm4, %v26_v23  }
  0x80   :  { %34 = vst.msk [vmem:[#allocation0] sm:$0x1] %vm33_vm5, %v32_v16  }
  0x81   :  { %40 = vst.msk [vmem:[#allocation0] sm:$0x1] %vm39_vm6, %v38_v17  }
  0x84   :  { %v44_v25 = vpop.permute.xlu0 %43   ;;  %v50_v26 = vpop.permute.xlu1 %49  }
  0x85   :  { %46 = vst.msk [vmem:[#allocation0] sm:$0x1] %vm45_vm7, %v44_v25  }
  0x86   :  { %52 = vst.msk [vmem:[#allocation0] sm:$0x1] %vm51_vm8, %v50_v26  }
  0x87   :  { %58 = vst.msk [vmem:[#allocation0] sm:$0x1] %vm57_vm9, %v56_v18  }
  0x8c   :  { %v62_v27 = vpop.permute.xlu0 %61   ;;  %v68_v28 = vpop.permute.xlu1 %67  }
  0x8d   :  { %64 = vst.msk [vmem:[#allocation0] sm:$0x1] %vm63_vm10, %v62_v27  }
  0x8e   :  { %70 = vst.msk [vmem:[#allocation0] sm:$0x1] %vm69_vm11, %v68_v28  }
  0x8f   :  { %76 = vst.msk [vmem:[#allocation0] sm:$0x1] %vm75_vm12, %v74_v21  }
  0x94   :  { %v80_v29 = vpop.permute.xlu0 %79   ;;  %v86_v30 = vpop.permute.xlu1 %85  }
  0x95   :  { %82 = vst.msk [vmem:[#allocation0] sm:$0x1] %vm81_vm13, %v80_v29  }
  0x96   :  { %88 = vst.msk [vmem:[#allocation0] sm:$0x1] %vm87_vm14, %v86_v30  }
  0x97   :  { %94 = vst.msk [vmem:[#allocation0] sm:$0x1] %vm93_vm15, %v92_v24  }
  0x9e   :  { %v97_v31 = vld [vmem:[#allocation0] sm:$0x1] }
  0x9f   :  { %100 = vst [vmem:[%s208_s1] sm:$0x1] %v97_v31 }

// kernel: tile.18
= control target key start
LH: loop header
LB: loop body
LE: loop exit
PB: predicated region body
PF: predicated region fallthrough
CT: control target
= control target key end

     0   :  { %s28_s0 = inlined_call_operand.vmem [shape: f32[8], index: 0, kind: input, shape index: {}]   ;;  %s29_s1 = inlined_call_operand.vmem [shape: f32[16,8], index: 1, kind: output, shape index: {}]  }
   0x1   :  { %v4_v0 = vld [vmem:[%s28_s0] ss:$0 sm:$0xff] }
   0x2   :  { %5 = vst [vmem:[%s29_s1] sm:$0xff] %v4_v0 }
   0x3   :  { %8 = vst [vmem:[%s29_s1 + $0x8] sm:$0xff] %v4_v0 }

// kernel: conv_scale_forward.3
= control target key start
LH: loop header
LB: loop body
LE: loop exit
PB: predicated region body
PF: predicated region fallthrough
CT: control target
= control target key end

     0   :  { %s2033_s30 = smov 0   ;;  %s2382_s0 = inlined_call_operand.vmem [shape: bf16[2,18,72], index: 0, kind: input, shape index: {}]   ;;  %s2383_s1 = inlined_call_operand.vmem [shape: bf16[2,18,36], index: 1, kind: input, shape index: {}]   ;;  %s2384_s2 = inlined_call_operand.vmem [shape: bf16[2,20,40], index: 2, kind: input, shape index: {}]   ;;  %s2385_s3 = inlined_call_operand.vmem [shape: bf16[2,22,44], index: 3, kind: input, shape index: {}]   ;;  %s2386_s4 = inlined_call_operand.vmem [shape: bf16[3,72,128], index: 4, kind: input, shape index: {}]   ;;  %s2387_s5 = inlined_call_operand.vmem [shape: bf16[3,36,128], index: 5, kind: input, shape index: {}]   ;;  %s2388_s6 = inlined_call_operand.vmem [shape: bf16[5,40,128], index: 6, kind: input, shape index: {}]   ;;  %s2389_s7 = inlined_call_operand.vmem [shape: bf16[7,44,128], index: 7, kind: input, shape index: {}]   ;;  %s2390_s8 = inlined_call_operand.vmem [shape: f32[1,128], index: 8, kind: input, shape index: {}]   ;;  %s2391_s9 = inlined_call_operand.vmem [shape: f32[2,16,128], index: 9, kind: output, shape index: {}]  }
   0x1 LB: > { %s1567_s10 = sadd.s32 4294967295, %s1981_s30   ;;  %p1571_p0 = scmp.ge.s32.totalorder %s1981_s30, 1  ;;  %s1981_s30 = sphi %s2033_s30, %s19_s30  }
   0x2   : > { %p317_p1 = scmp.lt.s32.totalorder %s1981_s30, 3 }
   0x4   : > { %p318_p2 = pnand %p1571_p0, %p317_p1 }
   0x5   : > { %p368_p3 = scmp.lt.s32.totalorder (!%p318_p2), %s1567_s10, 1 }
   0x6   : > { %321 = sbr.rel (%p318_p2) target bundleno = 242 (0xf2), region = 56 }
   0xb   : > { %v1586_v0 = vld [vmem:[%s2386_s4 + $0x44] sm:$0xf]  ;;  %v404_v1 = vld [vmem:[%s2386_s4 + $0x20] sm:$0xf]  ;;  %v1629_v4 = vld [vmem:[%s2386_s4 + $0x68] sm:$0xf] }
   0xc   : > { %v454_v2 = vunpack.c.l.b16 %v1586_v0  ;;  %v503_v3 = vunpack.c.l.b16 %v404_v1  ;;  %v605_v5 = vld [vmem:[%s2387_s5 + $0x10] sm:$0x3]  ;;  %vm468_vm0 = vcmask 1043456   ;;  %v567_v6 = vunpack.c.l.b16 %v1629_v4  ;;  %s2393_s10 = smov (!%p368_p3, %s1567_s10), 1  ;;  %v1664_v12 = vld [vmem:[%s2387_s5 + $0x24] sm:$0x3] }
   0xd   : > { %v620_v7 = vunpack.c.l.b16 %v605_v5  ;;  %vm630_vm1 = vcmask 1041408   ;;  %s2061_s21 = smul.u32 12, %s2393_s10  ;;  %v688_v15 = vunpack.c.l.b16 %v1664_v12  ;;  %v1898_v18 = vld [vmem:[%s2386_s4 + $0x3c] sm:$0xff]  ;;  %v1905_v21 = vld [vmem:[%s2387_s5 + $0x8] sm:$0xff]  ;;  %v1897_v22 = vld [vmem:[%s2386_s4 + $0x34] sm:$0xff]  ;;  %vm626_vm2 = vcmask 293888  }
   0xe   : > { %v459_v8 = vpack.c.b16 %v454_v2, %v454_v2  ;;  %v508_v9 = vpack.c.b16 %v503_v3, %v503_v3  ;;  %v572_v10 = vpack.c.b16 %v567_v6, %v567_v6  ;;  %v1894_v19 = vld [vmem:[%s2386_s4 + $0x18] sm:$0xff]  ;;  %v1902_v20 = vld [vmem:[%s2386_s4 + $0x60] sm:$0xff]  ;;  %v1893_v26 = vld [vmem:[%s2386_s4 + $0x10] sm:$0xff]  ;;  %vm424_vm3 = vsmask.f32 7424  ;;  %s1890_s18 = sshll.u32 %s2393_s10, 4 }
   0xf   : > { %v623_v11 = vpack.c.b16 %v620_v7, %v620_v7  ;;  %s372_s13 = scalar_lea.vmem %s2382_s0, %s2061_s21  ;;  %v691_v23 = vpack.c.b16 %v688_v15, %v688_v15  ;;  %v1901_v27 = vld [vmem:[%s2386_s4 + $0x58] sm:$0xff]  ;;  %v1904_v31 = vld [vmem:[%s2387_s5] sm:$0xff]  ;;  %s2103_s27 = scalar_lea.vmem %s2383_s1, %s2061_s21  ;;  %v772_v33 = vld [vmem:[%s2388_s6 + $0x10] sm:$0xf]  ;;  %vm546_vm4 = vcmask 1046528   ;;  %vm464_vm5 = vcmask 588800  }
  0x10   : > { %v470_v13 = vsel %vm468_vm0, %v459_v8, 0  ;;  %v516_v14 = vsel %vm468_vm0, %v508_v9, 0  ;;  %v581_v16 = vsel %vm468_vm0, %v572_v10, 0  ;;  %v2084_v24 = vld [vmem:[%s372_s13] sm:$0xff]   ;;  %v405_v25 = vld [vmem:[%s372_s13 + $0x8] sm:$0x1]  ;;  %v787_v50 = vunpack.c.l.b16 %v772_v33  ;;  %s2138_s26 = scalar_lea.vmem %s2384_s2, %s2061_s21  ;;  %s2281_s24 = scalar_lea.vmem %s2385_s3, %s2061_s21 }
  0x11   : > { %475 = vmatpush.bf16.msra.mxu0 %v470_v13  ;;  %521 = vmatpush.bf16.msra.mxu1 %v516_v14  ;;  %v632_v17 = vsel %vm630_vm1, %v623_v11, 0  ;;  %v421_v28 = vunpack.c.l.b16 %v405_v25  ;;  %v428_v29 = vshll.u32 %v2084_v24, 16  ;;  %v1678_v30 = vld [vmem:[%s2387_s5 + $0x38] sm:$0x3]  ;;  %v1705_v32 = vld [vmem:[%s2388_s6 + $0x24] sm:$0xf]  ;;  %s392_s22 = scalar_lea.vmem %s2391_s9, %s1890_s18 }
  0x12   : > { %586 = vmatpush.bf16.msra.mxu2 %v581_v16  ;;  %639 = vmatpush.bf16.msra.mxu3 %v632_v17  ;;  %v1959_v35 = vld [vmem:[%s372_s13] sm:$0xf0]  ;;  %v1960_v36 = vld [vmem:[%s372_s13] sm:$0xe]  ;;  %v652_v37 = vld [vmem:[%s2103_s27 + $0x8] sm:$0x1]  ;;  %v738_v39 = vunpack.c.l.b16 %v1678_v30  ;;  %v854_v46 = vunpack.c.l.b16 %v1705_v32  ;;  %v790_v1 = vpack.c.b16 %v787_v50, %v787_v50 }
  0x13   : > { %v2111_v34 = vpack.c.b16 %v421_v28, %v421_v28  ;;  %v698_v38 = vsel %vm630_vm1, %v691_v23, 0  ;;  %v1719_v40 = vld [vmem:[%s2388_s6 + $0x38] sm:$0xf]  ;;  %v1903_v41 = vld [vmem:[%s2103_s27] sm:$0xff]  ;;  %v1896_v42 = vld [vmem:[%s2386_s4 + $0x2c] sm:$0xff]  ;;  %v426_v43 = vshrl.u32 %v2084_v24, 16  ;;  %v1961_v49 = vor.u32 %v1960_v36, %v1959_v35 }
  0x14   : > { %v430_v44 = vrot.slane %v428_v29, 1  ;;  %v1892_v47 = vld [vmem:[%s2386_s4 + $0x8] sm:$0xff]  ;;  %v1900_v48 = vld [vmem:[%s2386_s4 + $0x50] sm:$0xff]  ;;  %v1948_v51 = vld [vmem:[%s2103_s27] sm:$0xff]   ;;  %v664_v52 = vunpack.c.l.b16 %v652_v37  ;;  %v904_v54 = vunpack.c.l.b16 %v1719_v40  ;;  %v741_v55 = vpack.c.b16 %v738_v39, %v738_v39 }
  0x15   : > { %476 = vmatpush.bf16.msra.mxu0 %v1898_v18  ;;  %522 = vmatpush.bf16.msra.mxu1 %v1894_v19  ;;  %v433_v45 = vshll.u32 %v2111_v34, 16  ;;  %v1907_v53 = vld [vmem:[%s2387_s5 + $0x1c] sm:$0xff]  ;;  %v1895_v56 = vld [vmem:[%s2386_s4 + $0x24] sm:$0xff]  ;;  %v857_v59 = vpack.c.b16 %v854_v46, %v854_v46  ;;  %v670_v60 = vshll.u32 %v1948_v51, 16  ;;  %v547_v63 = vrot.slane %v1961_v49, 1  ;;  %v1906_v4 = vld [vmem:[%s2387_s5 + $0x14] sm:$0xff] }
  0x16   : > { %587 = vmatpush.bf16.msra.mxu2 %v1902_v20  ;;  %640 = vmatpush.bf16.msra.mxu3 %v1905_v21  ;;  %v431_v57 = vor.u32 %v430_v44, %v426_v43  ;;  %v1891_v61 = vld [vmem:[%s2386_s4] sm:$0xff]  ;;  %v1899_v62 = vld [vmem:[%s2386_s4 + $0x48] sm:$0xff]  ;;  %v548_v0 = vrot.slane %v2111_v34, 1  ;;  %v2151_v2 = vpack.c.b16 %v664_v52, %v664_v52  ;;  %v907_v5 = vpack.c.b16 %v904_v54, %v904_v54  ;;  %v1909_v15 = vld [vmem:[%s2387_s5 + $0x30] sm:$0xff] }
  0x17   : > { %v435_v58 = vrot.slane %v433_v45, 1  ;;  %v1733_v3 = vld [vmem:[%s2388_s6 + $0x4c] sm:$0xf]  ;;  %v818_v6 = vld [vmem:[%s2138_s26 + $0x8] sm:$0x1]  ;;  %v748_v7 = vsel %vm630_vm1, %v741_v55, 0 }
  0x18   : > { %v668_v8 = vshrl.u32 %v1948_v51, 16  ;;  %v864_v10 = vsel %vm468_vm0, %v857_v59, 0  ;;  %v672_v11 = vrot.slane %v670_v60, 1  ;;  %v969_v12 = vunpack.c.l.b16 %v1733_v3  ;;  %v1747_v13 = vld [vmem:[%s2388_s6 + $0x60] sm:$0xf]  ;;  %v1912_v25 = vld [vmem:[%s2388_s6 + $0x8] sm:$0xff] }
  0x19   : > { %477 = vmatpush.bf16.msra.mxu0 %v1897_v22  ;;  %523 = vmatpush.bf16.msra.mxu1 %v1893_v26  ;;  %v436_v9 = vsel %vm424_vm3, %v431_v57, %v435_v58  ;;  %v549_v14 = vsel %vm546_vm4, %v547_v63, %v548_v0  ;;  %v798_v16 = vsel %vm468_vm0, %v790_v1, 0  ;;  %v675_v17 = vshll.u32 %v2151_v2, 16  ;;  %v2174_v20 = vld [vmem:[%s2138_s26] sm:$0xff]   ;;  %v1771_v21 = vld [vmem:[%s2389_s7 + $0x10] sm:$0xf]  ;;  %v1908_v37 = vld [vmem:[%s2387_s5 + $0x28] sm:$0xff] }
  0x1a   : > { %588 = vmatpush.bf16.msra.mxu2 %v1901_v27  ;;  %641 = vmatpush.bf16.msra.mxu3 %v1904_v31  ;;  %v830_v18 = vunpack.c.l.b16 %v818_v6  ;;  %v914_v19 = vsel %vm468_vm0, %v907_v5, 0  ;;  %v1924_v22 = vld [vmem:[%s2389_s7 + $0x10] sm:$0x30]  ;;  %v1914_v23 = vld [vmem:[%s2388_s6 + $0x1c] sm:$0xff]  ;;  %v1020_v26 = vunpack.c.l.b16 %v1747_v13  ;;  %v673_v27 = vor.u32 %v672_v11, %v668_v8  ;;  %v1790_v30 = vld [vmem:[%s2389_s7 + $0x28] sm:$0xf] }
  0x1b   : > { %v1916_v28 = vld [vmem:[%s2388_s6 + $0x30] sm:$0xff]  ;;  %v972_v29 = vpack.c.b16 %v969_v12, %v969_v12  ;;  %v1927_v31 = vld [vmem:[%s2389_s7 + $0x28] sm:$0x30]  ;;  %v677_v32 = vrot.slane %v675_v17, 1  ;;  %v1963_v33 = vld [vmem:[%s2103_s27] sm:$0xe]  ;;  %v1772_v36 = vor.u32 %v1924_v22, %v1771_v21  ;;  %v1954_v57 = vunpack.c.h.b16 %v2174_v20 }
  0x1c   : > { %v2203_v34 = vpack.c.b16 %v830_v18, %v830_v18  ;;  %v836_v35 = vshll.u32 %v2174_v20, 16  ;;  %vm1007_vm6 = vcmask 1045504   ;;  %v1023_v39 = vpack.c.b16 %v1020_v26, %v1020_v26  ;;  %v882_v45 = vld [vmem:[%s2138_s26] sm:$0xe]  ;;  %v1915_v49 = vld [vmem:[%s2388_s6 + $0x28] sm:$0xff]  ;;  %v1920_v1 = vld [vmem:[%s2388_s6 + $0x58] sm:$0xff] }
  0x1d   : > { %1659 = vmatmul.msk.bf16.vlgmr.msra.gmra.mxu3 %vm626_vm2, %v1903_v41  ;;  %478 = vmatpush.bf16.msra.mxu0 %v1896_v42  ;;  %v1791_v40 = vor.u32 %v1927_v31, %v1790_v30  ;;  %v1911_v41 = vld [vmem:[%s2388_s6] sm:$0xff]  ;;  %v834_v43 = vshrl.u32 %v2174_v20, 16  ;;  %v979_v44 = vsel %vm468_vm0, %v972_v29, 0  ;;  %v678_v46 = vsel %vm424_vm3, %v673_v27, %v677_v32  ;;  %v932_v51 = vld [vmem:[%s2138_s26 + $0x8] sm:$0x3]  ;;  %v1919_v17 = vld [vmem:[%s2388_s6 + $0x50] sm:$0xff] }
  0x1e   : > { %705 = vmatpush.bf16.msrb.mxu3 %v698_v38  ;;  %524 = vmatpush.bf16.msra.mxu1 %v1892_v47  ;;  %v1913_v38 = vld [vmem:[%s2388_s6 + $0x14] sm:$0xff]  ;;  %v838_v47 = vrot.slane %v836_v35, 1  ;;  %v1084_v50 = vsel %vm1007_vm6, %v1772_v36, 0  ;;  %v727_v52 = vrot.slane %v2151_v2, 1  ;;  %v1030_v54 = vsel %vm468_vm0, %v1023_v39, 0  ;;  %v1923_v59 = vld [vmem:[%s2389_s7 + $0x8] sm:$0xff] }
  0x1f   : > { %589 = vmatpush.bf16.msra.mxu2 %v1900_v48  ;;  %v841_v48 = vshll.u32 %v2203_v34, 16  ;;  %v1153_v55 = vsel %vm1007_vm6, %v1791_v40, 0  ;;  %v890_v58 = vunpack.c.l.b16 %v882_v45  ;;  %v940_v60 = vunpack.c.l.b16 %v932_v51  ;;  %v1847_v2 = vld [vmem:[%s2389_s7 + $0x70] sm:$0xf]  ;;  %v1936_v3 = vld [vmem:[%s2389_s7 + $0x70] sm:$0x30] }
  0x20   : > { %v839_v63 = vor.u32 %v838_v47, %v834_v43  ;;  %v1828_v5 = vld [vmem:[%s2389_s7 + $0x58] sm:$0xf]  ;;  %v1933_v6 = vld [vmem:[%s2389_s7 + $0x58] sm:$0x30]  ;;  %v1848_v12 = vor.u32 %v1936_v3, %v1847_v2  ;;  %vm793_vm7 = vcmask 326656   ;;  %v893_v31 = vrot.slane %v2203_v34, 1 }
  0x21   : > { %479 = vmatpush.bf16.msra.mxu0 %v1895_v56  ;;  %v843_v0 = vrot.slane %v841_v48, 1  ;;  %v2264_v11 = vpack.c.b16 %v940_v60, %v940_v60  ;;  %v997_v21 = vld [vmem:[%s2138_s26] sm:$0xc]  ;;  %v1939_v26 = vld [vmem:[%s2389_s7 + $0x88] sm:$0x30]  ;;  %vm1078_vm9 = vcmask 359424  }
  0x22   : > { %706 = vmatpush.bf16.msrb.mxu3 %v1907_v53  ;;  %525 = vmatpush.bf16.msra.mxu1 %v1891_v61  ;;  %v1918_v53 = vld [vmem:[%s2388_s6 + $0x44] sm:$0xff]  ;;  %v1809_v61 = vld [vmem:[%s2389_s7 + $0x40] sm:$0xf]  ;;  %v1326_v29 = vsel %vm1007_vm6, %v1848_v12, 0  ;;  %v1005_v32 = vunpack.c.l.b16 %v997_v21  ;;  %vm942_vm8 = vsmask.f32 6400 }
  0x23   : > { %590 = vmatpush.bf16.msra.mxu2 %v1899_v62  ;;  %v1930_v62 = vld [vmem:[%s2389_s7 + $0x40] sm:$0x30]  ;;  %v844_v13 = vsel %vm424_vm3, %v839_v63, %v843_v0  ;;  %v952_v27 = vshrl.u32 %v2264_v11, 16  ;;  %v1104_v35 = vld [vmem:[%s2281_s24 + $0x8] sm:$0x1]  ;;  %vm1423_vm11 = vcmask 1044480  }
  0x24   : > { %1603 = vmatmul.msk.bf16.vlgmr.msra.gmra.mxu0 %vm464_vm5, %v436_v9  ;;  %v1910_v9 = vld [vmem:[%s2138_s26] sm:$0xff]  ;;  %v1935_v34 = vld [vmem:[%s2389_s7 + $0x68] sm:$0xff]  ;;  %v1006_v43 = vpack.c.b16 %v1954_v57, %v1005_v32  ;;  %vm1355_vm10 = vsmask.f32 5376 }
  0x25   : > { %755 = vmatpush.bf16.msrb.mxu0 %v748_v7  ;;  %1620 = vmatmul.msk.bf16.vlgmr.msra.gmra.mxu1 %vm464_vm5, %v2084_v24  ;;  %v1962_v24 = vld [vmem:[%s2103_s27] sm:$0xf0]  ;;  %v1810_v7 = vor.u32 %v1930_v62, %v1809_v61  ;;  %v954_v39 = vrot.slane %v952_v27, 1  ;;  %v1171_v45 = vld [vmem:[%s2281_s24] sm:$0xe] }
  0x26   : > { %707 = vmatpush.bf16.msrb.mxu3 %v1906_v4  ;;  %1646 = vmatmul.msk.bf16.vlgmr.msra.gmra.mxu2 %vm464_vm5, %v549_v14  ;;  %v1964_v42 = vor.u32 %v1963_v33, %v1962_v24  ;;  %v1926_v4 = vld [vmem:[%s2389_s7 + $0x20] sm:$0xff]  ;;  %v1929_v33 = vld [vmem:[%s2389_s7 + $0x38] sm:$0xff] }
  0x27   : > { %871 = vmatpush.bf16.msrb.mxu2 %v864_v10  ;;  %805 = vmatpush.bf16.msrb.mxu1 %v798_v16  ;;  %v891_v10 = vpack.c.b16 %v1954_v57, %v890_v58  ;;  %v1917_v14 = vld [vmem:[%s2388_s6 + $0x3c] sm:$0xff]  ;;  %v1829_v16 = vor.u32 %v1933_v6, %v1828_v5  ;;  %v1206_v22 = vsel %vm1007_vm6, %v1810_v7, 0  ;;  %v1008_v58 = vrot.slane %v1006_v43, 2 }
  0x28   : > { %v726_v56 = vrot.slane %v1964_v42, 1  ;;  %v1956_v47 = vld [vmem:[%s2281_s24] sm:$0xff]  }
  0x29   : > { %756 = vmatpush.bf16.msrb.mxu0 %v1909_v15  ;;  %v1922_v15 = vld [vmem:[%s2389_s7] sm:$0xff]  ;;  %v944_v18 = vshrl.u32 %v891_v10, 16  ;;  %v892_v30 = vrot.slane %v891_v10, 1  ;;  %v1273_v24 = vsel %vm1007_vm6, %v1829_v16, 0  ;;  %v1123_v61 = vshll.u32 %v1956_v47, 16 }
  0x2a   : > { %921 = vmatpush.bf16.msra.mxu3 %v914_v19  ;;  %v728_v8 = vsel %vm546_vm4, %v726_v56, %v727_v52  ;;  %v947_v19 = vshll.u32 %v891_v10, 16  ;;  %v1934_v51 = vld [vmem:[%s2389_s7 + $0x60] sm:$0xff]  ;;  %v1180_v56 = vunpack.c.l.b16 %v1171_v45  ;;  %v1121_v6 = vshrl.u32 %v1956_v47, 16 }
  0x2b   : > { %872 = vmatpush.bf16.msrb.mxu2 %v1914_v23  ;;  %806 = vmatpush.bf16.msrb.mxu1 %v1912_v25  ;;  %v1925_v23 = vld [vmem:[%s2389_s7 + $0x18] sm:$0xff]  ;;  %v1866_v25 = vld [vmem:[%s2389_s7 + $0x88] sm:$0xf]  ;;  %v894_v42 = vsel %vm546_vm4, %v892_v30, %v893_v31  ;;  %v1885_v20 = vld [vmem:[%s2389_s7 + $0xa0] sm:$0xf]  ;;  %v1125_v7 = vrot.slane %v1123_v61, 1 }
  0x2c   : > { %v1867_v36 = vor.u32 %v1939_v26, %v1866_v25  ;;  %v1942_v52 = vld [vmem:[%s2389_s7 + $0xa0] sm:$0x30]  ;;  %v1940_v30 = vld [vmem:[%s2389_s7 + $0x90] sm:$0xff] }
  0x2d   : > { %757 = vmatpush.bf16.msrb.mxu0 %v1908_v37  ;;  %1673 = vmatmul.msk.bf16.vlgmr.msrb.gmra.mxu3 %vm626_vm2, %v678_v46  ;;  %v946_v37 = vrot.slane %v944_v18, 1  ;;  %v1224_v46 = vld [vmem:[%s2281_s24 + $0x8] sm:$0x3]  ;;  %v1938_v62 = vld [vmem:[%s2389_s7 + $0x80] sm:$0xff]  ;;  %v1886_v63 = vor.u32 %v1942_v52, %v1885_v20 }
  0x2e   : > { %922 = vmatpush.bf16.msra.mxu3 %v1916_v28  ;;  %v955_v28 = vshll.u32 %v2264_v11, 16  ;;  %v1394_v48 = vsel %vm1007_vm6, %v1867_v36, 0  ;;  %v1233_v57 = vunpack.c.l.b16 %v1224_v46 }
  0x2f   : > { %873 = vmatpush.bf16.msrb.mxu2 %v1913_v38  ;;  %807 = vmatpush.bf16.msrb.mxu1 %v1911_v41  ;;  %v949_v38 = vrot.slane %v947_v19, 2  ;;  %v1932_v41 = vld [vmem:[%s2389_s7 + $0x50] sm:$0xff]  ;;  %v1448_v10 = vsel %vm1007_vm6, %v1886_v63, 0  ;;  %v1941_v19 = vld [vmem:[%s2389_s7 + $0x98] sm:$0xff] }
  0x30   : > { %v957_v40 = vrot.slane %v955_v28, 2  ;;  %v1234_v3 = vpack.c.b16 %v1233_v57, %v1233_v57 }
  0x31   : > { %986 = vmatpush.bf16.msra.mxu0 %v979_v44  ;;  %v1117_v44 = vunpack.c.l.b16 %v1104_v35 }
  0x32   : > { %923 = vmatpush.bf16.msra.mxu3 %v1915_v49  ;;  %v1928_v49 = vld [vmem:[%s2389_s7 + $0x30] sm:$0xff]  ;;  %v1247_v16 = vshll.u32 %v1234_v3, 16 }
  0x33   : > { %1091 = vmatpush.bf16.msra.mxu2 %v1084_v50  ;;  %1037 = vmatpush.bf16.msra.mxu1 %v1030_v54  ;;  %v950_v50 = vor.u32 %v949_v38, %v946_v37  ;;  %v2331_v54 = vunpack.c.h.b16 %v1956_v47  ;;  %v1119_v60 = vpack.c.b16 %v1117_v44, %v1117_v44  ;;  %v1412_v47 = vld [vmem:[%s2281_s24] sm:$0x8] }
  0x34   : > { %1687 = vmatmul.msk.bf16.vlgmr.msrb.gmra.mxu0 %vm626_vm2, %v728_v8  ;;  %v1249_v27 = vrot.slane %v1247_v16, 2 }
  0x35   : > { %987 = vmatpush.bf16.msra.mxu0 %v1918_v53  ;;  %1700 = vmatmul.msk.bf16.vlgmr.msrb.gmra.mxu1 %vm793_vm7, %v1910_v9  ;;  %v958_v53 = vor.u32 %v957_v40, %v954_v39  ;;  %v1181_v2 = vpack.c.b16 %v2331_v54, %v1180_v56  ;;  %v1128_v8 = vshll.u32 %v1119_v60, 16  ;;  %v1937_v9 = vld [vmem:[%s2389_s7 + $0x78] sm:$0xff]  ;;  %v1183_v32 = vrot.slane %v1119_v60, 1 }
  0x36   : > { %1160 = vmatpush.bf16.msrb.mxu3 %v1153_v55  ;;  %1714 = vmatmul.msk.bf16.vlgmr.msrb.gmra.mxu2 %vm793_vm7, %v844_v13  ;;  %v1931_v55 = vld [vmem:[%s2389_s7 + $0x48] sm:$0xff] }
  0x37   : > { %1092 = vmatpush.bf16.msra.mxu2 %v1923_v59  ;;  %1038 = vmatpush.bf16.msra.mxu1 %v1920_v1  ;;  %v1009_v59 = vrot.slane %v2264_v11, 2  ;;  %v959_v0 = vsel %vm942_vm8, %v950_v50, %v958_v53  ;;  %v1921_v1 = vld [vmem:[%s2281_s24] sm:$0xff]  ;;  %v1344_v11 = vld [vmem:[%s2281_s24 + $0x8] sm:$0x7]  ;;  %v1236_v13 = vshrl.u32 %v1181_v2, 16  ;;  %v1130_v18 = vrot.slane %v1128_v8, 1 }
  0x38   : > { %v1353_v21 = vunpack.c.l.b16 %v1344_v11  ;;  %v1182_v31 = vrot.slane %v1181_v2, 1 }
  0x39   : > { %988 = vmatpush.bf16.msra.mxu0 %v1917_v14  ;;  %v1010_v5 = vsel %vm1007_vm6, %v1008_v58, %v1009_v59  ;;  %v1239_v14 = vshll.u32 %v1181_v2, 16 }
  0x3a   : > { %1161 = vmatpush.bf16.msrb.mxu3 %v1926_v4  ;;  %v1291_v4 = vld [vmem:[%s2281_s24] sm:$0xc]  ;;  %v1184_v40 = vsel %vm546_vm4, %v1182_v31, %v1183_v32 }
  0x3b   : > { %1093 = vmatpush.bf16.msra.mxu2 %v1922_v15  ;;  %1039 = vmatpush.bf16.msra.mxu1 %v1919_v17  ;;  %v1300_v12 = vunpack.c.l.b16 %v1291_v4  ;;  %v1244_v15 = vshrl.u32 %v1234_v3, 16  ;;  %v1126_v17 = vor.u32 %v1125_v7, %v1121_v6  ;;  %v1241_v25 = vrot.slane %v1239_v14, 2 }
  0x3d   : > { %1213 = vmatpush.bf16.msrb.mxu0 %v1206_v22  ;;  %1728 = vmatmul.msk.bf16.vlgmr.msra.gmra.mxu3 %vm793_vm7, %v894_v42  ;;  %v1301_v22 = vpack.c.b16 %v2331_v54, %v1300_v12  ;;  %v1246_v26 = vrot.slane %v1244_v15, 1  ;;  %v1131_v28 = vsel %vm424_vm3, %v1126_v17, %v1130_v18 }
  0x3e   : > { %1162 = vmatpush.bf16.msrb.mxu3 %v1925_v23  ;;  %v1238_v23 = vrot.slane %v1236_v13, 1 }
  0x3f   : > { %1333 = vmatpush.bf16.msrb.mxu2 %v1326_v29  ;;  %1280 = vmatpush.bf16.msrb.mxu1 %v1273_v24  ;;  %v1354_v29 = vpack.c.b16 %v1353_v21, %v1353_v21  ;;  %v1302_v24 = vrot.slane %v1301_v22, 2  ;;  %v1250_v36 = vor.u32 %v1249_v27, %v1246_v26  ;;  %v1357_v37 = vshrl.u32 %v1301_v22, 16 }
  0x40   : > { %v1242_v35 = vor.u32 %v1241_v25, %v1238_v23  ;;  %v1360_v38 = vshll.u32 %v1301_v22, 16 }
  0x41   : > { %1214 = vmatpush.bf16.msrb.mxu0 %v1929_v33  ;;  %v1303_v33 = vrot.slane %v1234_v3, 2  ;;  %v1368_v39 = vshll.u32 %v1354_v29, 16  ;;  %v1359_v43 = vrot.slane %v1357_v37, 2  ;;  %v1425_v53 = vrot.slane %v1354_v29, 3 }
  0x42   : > { %1401 = vmatpush.bf16.msra.mxu3 %v1394_v48  ;;  %v1251_v42 = vsel %vm942_vm8, %v1242_v35, %v1250_v36  ;;  %v1362_v44 = vrot.slane %v1360_v38, 3  ;;  %v1421_v48 = vunpack.c.l.b16 %v1412_v47 }
  0x43   : > { %1334 = vmatpush.bf16.msrb.mxu2 %v1935_v34  ;;  %1281 = vmatpush.bf16.msrb.mxu1 %v1932_v41  ;;  %v1365_v34 = vshrl.u32 %v1354_v29, 16  ;;  %v1304_v41 = vsel %vm1007_vm6, %v1302_v24, %v1303_v33  ;;  %v1370_v46 = vrot.slane %v1368_v39, 3 }
  0x44   : > { %1742 = vmatmul.msk.bf16.vlgmr.msra.gmra.mxu0 %vm793_vm7, %v959_v0 }
  0x45   : > { %1215 = vmatpush.bf16.msrb.mxu0 %v1928_v49  ;;  %1756 = vmatmul.msk.bf16.vlgmr.msra.gmra.mxu1 %vm793_vm7, %v1010_v5  ;;  %v1367_v45 = vrot.slane %v1365_v34, 2  ;;  %v1363_v49 = vor.u32 %v1362_v44, %v1359_v43 }
  0x46   : > { %1402 = vmatpush.bf16.msra.mxu3 %v1938_v62  ;;  %1773 = vmatmul.msk.bf16.vlgmr.msra.gmra.mxu2 %vm1078_vm9, %v1921_v1 }
  0x47   : > { %1335 = vmatpush.bf16.msrb.mxu2 %v1934_v51  ;;  %1282 = vmatpush.bf16.msrb.mxu1 %v1931_v55  ;;  %v1371_v50 = vor.u32 %v1370_v46, %v1367_v45  ;;  %v1422_v51 = vpack.c.b16 %v2331_v54, %v1421_v48 }
  0x49   : > { %1455 = vmatpush.bf16.msra.mxu0 %v1448_v10  ;;  %v1372_v20 = vsel %vm1355_vm10, %v1363_v49, %v1371_v50  ;;  %v1424_v52 = vrot.slane %v1422_v51, 3 }
  0x4a   : > { %1403 = vmatpush.bf16.msra.mxu3 %v1937_v9 }
  0x4b   : > { %v1426_v55 = vsel %vm1423_vm11, %v1424_v52, %v1425_v53  ;;  %v1974_v52 = vld [vmem:[%s2390_s8] ss:$0 sm:$0xff] }
  0x4d   : > { %1456 = vmatpush.bf16.msra.mxu0 %v1941_v19  ;;  %1792 = vmatmul.msk.bf16.vlgmr.msrb.gmra.mxu3 %vm1078_vm9, %v1131_v28 }
  0x51   : > { %1457 = vmatpush.bf16.msra.mxu0 %v1940_v30 }
  0x54   : > { %1811 = vmatmul.msk.bf16.vlgmr.msrb.gmra.mxu0 %vm1078_vm9, %v1184_v40 }
  0x55   : > { %1830 = vmatmul.msk.bf16.vlgmr.msrb.gmra.mxu1 %vm1078_vm9, %v1251_v42 }
  0x56   : > { %1849 = vmatmul.msk.bf16.vlgmr.msrb.gmra.mxu2 %vm1078_vm9, %v1304_v41 }
  0x5d   : > { %1868 = vmatmul.msk.bf16.vlgmr.msra.gmra.mxu3 %vm1078_vm9, %v1372_v20 }
  0x64   : > { %1887 = vmatmul.msk.bf16.vlgmr.msra.gmra.mxu0 %vm1078_vm9, %v1426_v55 }
  0xa0   : > { %v643_v56 = vpop.f32.mrf.mxu3 }
  0xa1   : > { %v481_v57 = vpop.f32.mrf.mxu0 }
  0xa2   : > { %v527_v58 = vpop.f32.mrf.mxu1 }
  0xa3   : > { %v528_v2 = vadd.f32 %v527_v58, %v481_v57 }
  0xa8   : > { %v645_v60 = vpop.f32.mrf.mxu3 }
  0xa9   : > { %v592_v59 = vpop.f32.mrf.mxu2  ;;  %v483_v61 = vpop.f32.mrf.mxu0 }
  0xaa   : > { %v529_v62 = vpop.f32.mrf.mxu1  ;;  %v597_v3 = vadd.f32 %v592_v59, %v528_v2 }
  0xab   : > { %v530_v9 = vadd.f32 %v529_v62, %v483_v61 }
  0xac   : > { %v648_v8 = vadd.f32 %v643_v56, %v597_v3 }
  0xb0   : > { %v709_v0 = vpop.f32.mrf.mxu3 }
  0xb1   : > { %v594_v63 = vpop.f32.mrf.mxu2  ;;  %v759_v1 = vpop.f32.mrf.mxu0  ;;  %v714_v10 = vadd.f32 %v709_v0, %v648_v8 }
  0xb2   : > { %v809_v54 = vpop.f32.mrf.mxu1  ;;  %v598_v11 = vadd.f32 %v594_v63, %v530_v9 }
  0xb3   : > { %v764_v14 = vadd.f32 %v759_v1, %v714_v10 }
  0xb4   : > { %v649_v16 = vadd.f32 %v645_v60, %v598_v11 }
  0xb5   : > { %v814_v18 = vadd.f32 %v809_v54, %v764_v14 }
  0xb8   : > { %v711_v4 = vpop.f32.mrf.mxu3 }
  0xb9   : > { %v875_v5 = vpop.f32.mrf.mxu2  ;;  %v761_v6 = vpop.f32.mrf.mxu0  ;;  %v715_v19 = vadd.f32 %v711_v4, %v649_v16 }
  0xba   : > { %v811_v7 = vpop.f32.mrf.mxu1  ;;  %v880_v21 = vadd.f32 %v875_v5, %v814_v18 }
  0xbb   : > { %v765_v25 = vadd.f32 %v761_v6, %v715_v19 }
  0xbd   : > { %v815_v28 = vadd.f32 %v811_v7, %v765_v25 }
  0xc0   : > { %v925_v13 = vpop.f32.mrf.mxu3 }
  0xc1   : > { %v877_v12 = vpop.f32.mrf.mxu2  ;;  %v990_v15 = vpop.f32.mrf.mxu0  ;;  %v930_v26 = vadd.f32 %v925_v13, %v880_v21 }
  0xc2   : > { %v1041_v17 = vpop.f32.mrf.mxu1  ;;  %v881_v31 = vadd.f32 %v877_v12, %v815_v28 }
  0xc3   : > { %v995_v29 = vadd.f32 %v990_v15, %v930_v26 }
  0xc5   : > { %v1046_v33 = vadd.f32 %v1041_v17, %v995_v29 }
  0xc8   : > { %v927_v22 = vpop.f32.mrf.mxu3 }
  0xc9   : > { %v1095_v23 = vpop.f32.mrf.mxu2  ;;  %v992_v27 = vpop.f32.mrf.mxu0  ;;  %v931_v35 = vadd.f32 %v927_v22, %v881_v31 }
  0xca   : > { %v1043_v30 = vpop.f32.mrf.mxu1  ;;  %v1100_v37 = vadd.f32 %v1095_v23, %v1046_v33 }
  0xcb   : > { %v996_v38 = vadd.f32 %v992_v27, %v931_v35 }
  0xcd   : > { %v1047_v41 = vadd.f32 %v1043_v30, %v996_v38 }
  0xd0   : > { %v1164_v24 = vpop.f32.mrf.mxu3 }
  0xd1   : > { %v1097_v32 = vpop.f32.mrf.mxu2  ;;  %v1217_v36 = vpop.f32.mrf.mxu0  ;;  %v1169_v34 = vadd.f32 %v1164_v24, %v1100_v37 }
  0xd2   : > { %v1284_v39 = vpop.f32.mrf.mxu1  ;;  %v1101_v45 = vadd.f32 %v1097_v32, %v1047_v41 }
  0xd3   : > { %v1222_v42 = vadd.f32 %v1217_v36, %v1169_v34 }
  0xd5   : > { %v1289_v46 = vadd.f32 %v1284_v39, %v1222_v42 }
  0xd8   : > { %v1166_v40 = vpop.f32.mrf.mxu3 }
  0xd9   : > { %v1219_v43 = vpop.f32.mrf.mxu0  ;;  %v1337_v44 = vpop.f32.mrf.mxu2  ;;  %v1170_v47 = vadd.f32 %v1166_v40, %v1101_v45 }
  0xda   : > { %v1342_v48 = vadd.f32 %v1337_v44, %v1289_v46  ;;  %v1286_v53 = vpop.f32.mrf.mxu1 }
  0xdb   : > { %v1223_v50 = vadd.f32 %v1219_v43, %v1170_v47 }
  0xdd   : > { %v1290_v57 = vadd.f32 %v1286_v53, %v1223_v50 }
  0xe0   : > { %v1405_v49 = vpop.f32.mrf.mxu3 }
  0xe1   : > { %v1410_v51 = vadd.f32 %v1405_v49, %v1342_v48  ;;  %v1459_v20 = vpop.f32.mrf.mxu0  ;;  %v1339_v56 = vpop.f32.mrf.mxu2 }
  0xe2   : > { %v1343_v59 = vadd.f32 %v1339_v56, %v1290_v57 }
  0xe3   : > { %v1464_v55 = vadd.f32 %v1459_v20, %v1410_v51 }
  0xe5   : > { %v1470_v58 = vadd.f32 %v1974_v52, %v1464_v55 }
  0xe7   : > { %v1472_v60 = vmax.f32 %v1470_v58, 0.0 }
  0xe8   : > { %v1407_v61 = vpop.f32.mrf.mxu3 }
  0xe9   : > { %1474 = vst [vmem:[%s392_s22] sm:$0xff] %v1472_v60  ;;  %v1411_v62 = vadd.f32 %v1407_v61, %v1343_v59  ;;  %v1461_v63 = vpop.f32.mrf.mxu0 }
  0xeb   : > { %v1465_v0 = vadd.f32 %v1461_v63, %v1411_v62 }
  0xed   : > { %v1471_v1 = vadd.f32 %v1974_v52, %v1465_v0 }
  0xef   : > { %v1473_v54 = vmax.f32 %v1471_v1, 0.0 }
  0xf1   : > { %1475 = vst [vmem:[%s392_s22 + $0x8] sm:$0xff] %v1473_v54 }
  0xf2 PF: > { %s19_s30 = sadd.s32 1, %s1981_s30  }
  0xf3   : > { %p16_p4 = scmp.ge.s32.totalorder %s19_s30, 4  }
  0xf5   :  { %18 = sbr.rel (!%p16_p4) target bundleno = 1 (0x1), region = 109 }

</bundles_post_ra>
